<compile_context>
chip_gen: v6e
topology: v6e:2x2x1
jax: 0.10.0
libtpu: 0.0.40
codegen_flags: <defaults>
</compile_context>

<pallas_src>
import jax
import jax.numpy as jnp
from jax import lax
from jax.experimental import pallas as pl
from jax.experimental.pallas import tpu as pltpu

_CHUNK = 128  # lane-chunk processed per inner step of the fused kernel


def _ceil_to(x, m):
    return (x + m - 1) // m * m


# ----------------------------------------------------------------------------
# Fused kernel: channel-major input -> (decoded boxes, permuted raw prediction)
# ----------------------------------------------------------------------------
def _yolo_fused_kernel(x_ref, add_ref, mul_ref, dec_ref, perm_ref, pad_ref):
    # x_ref   : (TB, 1, C, HW)  raw channel-major predictions (TB batches, 1 anchor)
    # add_ref : (HW, C)         resident: grid_x*stride, grid_y*stride on ch 0..1, else 0
    # mul_ref : (A, 1, C)       resident: [stride, stride, aw, ah, 1, ...] per anchor
    # dec_ref : (TB, 1, HW, C)  decoded boxes (float32)
    # perm_ref: (TB, 1, HW, C)  permuted raw predictions (input dtype)
    # pad_ref : (Cpad, CHUNK)   f32 scratch that makes the transpose tile-aligned
    a = pl.program_id(1)
    mul = mul_ref[a]                                    # (1, C), resident load

    tb = x_ref.shape[0]
    c = x_ref.shape[2]
    hw = x_ref.shape[3]

    for b in range(tb):
        for c0 in range(0, hw, _CHUNK):
            n = min(_CHUNK, hw - c0)
            # channel-major slab -> aligned scratch -> XLU transpose -> rows.
            pad_ref[:c, :n] = x_ref[b, 0, :, c0:c0 + n].astype(jnp.float32)
            xt = jnp.swapaxes(pad_ref[...], 0, 1)[:n, :c]        # (n, C) rows
            perm_ref[b, 0, c0:c0 + n, :] = xt.astype(perm_ref.dtype)

            t = jnp.exp(-xt)                    # one EUP exp pass, shared
            sig = pl.reciprocal(1.0 + t)        # sigmoid(x)
            ex = pl.reciprocal(t)               # exp(x); only kept on ch 2..3
            ch_idx = lax.broadcasted_iota(jnp.int32, xt.shape, 1)
            sel = jnp.where((ch_idx >= 2) & (ch_idx < 4), ex, sig)
            dec_ref[b, 0, c0:c0 + n, :] = sel * mul + add_ref[c0:c0 + n, :]


def _forward_fused(x_r, add_const, mul_const, perm_dtype, tb, vmem_limit):
    B, A, C, HW = x_r.shape
    c_pad = _ceil_to(C, 128)
    return pl.pallas_call(
        _yolo_fused_kernel,
        out_shape=(jax.ShapeDtypeStruct((B, A, HW, C), jnp.float32),
                   jax.ShapeDtypeStruct((B, A, HW, C), perm_dtype)),
        grid_spec=pltpu.PrefetchScalarGridSpec(
            num_scalar_prefetch=0,
            grid=(B // tb, A),
            in_specs=[
                pl.BlockSpec((tb, 1, C, HW), lambda b, a: (b, a, 0, 0)),
                pl.BlockSpec((HW, C), lambda b, a: (0, 0)),
                pl.BlockSpec((A, 1, C), lambda b, a: (0, 0, 0)),
            ],
            out_specs=[
                pl.BlockSpec((tb, 1, HW, C), lambda b, a: (b, a, 0, 0)),
                pl.BlockSpec((tb, 1, HW, C), lambda b, a: (b, a, 0, 0)),
            ],
            scratch_shapes=[pltpu.VMEM((c_pad, _CHUNK), jnp.float32)],
        ),
        compiler_params=pltpu.CompilerParams(
            dimension_semantics=("parallel", "parallel"),
            vmem_limit_bytes=vmem_limit),
    )(x_r, add_const, mul_const)


# ----------------------------------------------------------------------------
# Fallback kernel (previously validated): reads the already-permuted tensor.
# ----------------------------------------------------------------------------
def _yolo_rowmajor_kernel(p_ref, add_ref, mul_ref, dec_ref):
    # p_ref : (1, 1, HW, C) permuted predictions for one (batch, anchor)
    x = p_ref[0, 0].astype(jnp.float32)                  # (HW, C)
    sig = jax.nn.sigmoid(x)
    ch_idx = lax.broadcasted_iota(jnp.int32, x.shape, 1)
    is_wh = (ch_idx >= 2) & (ch_idx < 4)
    ex = jnp.exp(jnp.where(is_wh, x, 0.0))                # masked to avoid overflow
    sel = jnp.where(is_wh, ex, sig)
    dec_ref[0, 0] = sel * mul_ref[0] + add_ref[...]


def _forward_split(p_flat, add_const, mul_const, vmem_limit):
    B, A, HW, C = p_flat.shape
    return pl.pallas_call(
        _yolo_rowmajor_kernel,
        out_shape=jax.ShapeDtypeStruct((B, A, HW, C), jnp.float32),
        grid_spec=pltpu.PrefetchScalarGridSpec(
            num_scalar_prefetch=0,
            grid=(B, A),
            in_specs=[
                pl.BlockSpec((1, 1, HW, C), lambda b, a: (b, a, 0, 0)),
                pl.BlockSpec((HW, C), lambda b, a: (0, 0)),
                pl.BlockSpec((1, 1, C), lambda b, a: (a, 0, 0)),
            ],
            out_specs=pl.BlockSpec((1, 1, HW, C), lambda b, a: (b, a, 0, 0)),
        ),
        compiler_params=pltpu.CompilerParams(
            dimension_semantics=("parallel", "parallel"),
            vmem_limit_bytes=vmem_limit),
    )(p_flat, add_const, mul_const)


# ----------------------------------------------------------------------------
# Wrapper
# ----------------------------------------------------------------------------
def _yolo_constants(anchors, num_classes, stride, H, W):
    A = anchors.shape[0]
    C = num_classes + 5
    HW = H * W
    # torch.meshgrid 'ij': yv, xv; stack((xv, yv)).  Fold stride into the adds.
    yv, xv = jnp.meshgrid(jnp.arange(H, dtype=jnp.float32),
                          jnp.arange(W, dtype=jnp.float32), indexing="ij")
    grid2 = jnp.stack([xv, yv], axis=-1).reshape(HW, 2) * float(stride)
    add_const = jnp.concatenate(
        [grid2, jnp.zeros((HW, C - 2), jnp.float32)], axis=1)             # (HW, C)
    # per-anchor multiplicative constants: [stride, stride, aw, ah, 1, ...]
    # (anchor_vec * stride == anchors, so stride is fully folded).
    mul_const = jnp.concatenate(
        [jnp.full((A, 2), float(stride), jnp.float32),
         anchors.astype(jnp.float32),
         jnp.ones((A, C - 4), jnp.float32)], axis=1).reshape(A, 1, C)      # (A,1,C)
    return add_const, mul_const


def _vmem_capacity_bytes():
    try:
        return int(pltpu.get_tpu_info().vmem_capacity_bytes)
    except Exception:
        return 64 << 20          # conservative (v7x-sized) fallback


def _plan_tiling(B, C, HW, in_itemsize, num_anchors):
    """Pick the batch fold TB and a padded-layout VMEM limit."""
    # Per-batch-element VMEM bytes of one block, with (sublane, lane) padding.
    in_b = _ceil_to(C, 8) * _ceil_to(HW, 128) * in_itemsize        # (C, HW) tile
    dec_b = _ceil_to(HW, 8) * _ceil_to(C, 128) * 4                 # (HW, C) tile
    perm_b = _ceil_to(HW, 8) * _ceil_to(C, 128) * in_itemsize
    per_b = in_b + dec_b + perm_b
    fixed = (2 * _ceil_to(HW, 8) * _ceil_to(C, 128) * 4            # add_const (x2 bufs)
             + 2 * num_anchors * 8 * _ceil_to(C, 128) * 4          # mul_const (x2 bufs)
             + _ceil_to(C, 128) * _CHUNK * 4                       # transpose scratch
             + (1 << 20))                                          # slack
    budget = max(_vmem_capacity_bytes() - (8 << 20), 16 << 20)

    tb = 1
    for cand in range(1, min(B, 8) + 1):
        if B % cand:
            continue
        if cand * per_b <= (2 << 20) and fixed + 2 * cand * per_b <= budget:
            tb = cand
    vmem_need = fixed + 2 * tb * per_b
    vmem_limit = int(min(max(vmem_need, 8 << 20), budget))
    return tb, vmem_limit


def yolo_layer_forward(pred_nchw, anchors, num_classes, stride, training=False):
    """JAX/Pallas equivalent of YOLOLayer.forward (NCHW input)."""
    B, Cin, H, W = pred_nchw.shape
    A = anchors.shape[0]
    C = num_classes + 5
    assert Cin == A * C, (Cin, A, C)
    HW = H * W

    if training:
        # training path is a pure view/permute; no decode kernel needed.
        return pred_nchw.reshape(B, A, C, H, W).transpose(0, 1, 3, 4, 2)

    add_const, mul_const = _yolo_constants(anchors, num_classes, stride, H, W)
    tb, vmem_limit = _plan_tiling(B, C, HW, pred_nchw.dtype.itemsize, A)

    # free reshape: channel-major view of the raw conv output (no data movement)
    x_r = pred_nchw.reshape(B, A, C, HW)

    try:
        dec, perm = _forward_fused(x_r, add_const, mul_const,
                                   pred_nchw.dtype, tb, vmem_limit)
        # force compile/execute now so any lowering issue is caught here
        jax.block_until_ready((dec, perm))
    except Exception:
        # Conservative fallback (previously validated design): XLA transpose +
        # row-major decode kernel.  Used only if the fused path fails to lower.
        p = pred_nchw.reshape(B, A, C, H, W).transpose(0, 1, 3, 4, 2)
        perm = p.reshape(B, A, HW, C)
        dec = _forward_split(perm, add_const, mul_const, vmem_limit)

    pred_result = dec.reshape(B, A * HW, C)
    pred_perm = perm.reshape(B, A, H, W, C)
    return pred_result, pred_perm


def _reference_forward(pred_nchw, anchors, num_classes, stride):
    """Pure-JAX/XLA reference mirroring the PyTorch eval forward."""
    B, Cin, H, W = pred_nchw.shape
    A = anchors.shape[0]
    C = num_classes + 5
    p = pred_nchw.reshape(B, A, C, H, W).transpose(0, 1, 3, 4, 2)
    pf = p.astype(jnp.float32)
    yv, xv = jnp.meshgrid(jnp.arange(H, dtype=jnp.float32),
                          jnp.arange(W, dtype=jnp.float32), indexing="ij")
    grid = jnp.stack([xv, yv], axis=-1).reshape(1, 1, H, W, 2)
    anchor_wh = (anchors.astype(jnp.float32) / float(stride)).reshape(1, A, 1, 1, 2)
    xy = (jax.nn.sigmoid(pf[..., :2]) + grid) * float(stride)
    wh = (jnp.exp(pf[..., 2:4]) * anchor_wh) * float(stride)
    conf = jax.nn.sigmoid(pf[..., 4:])
    dec = jnp.concatenate([xy, wh, conf], axis=-1)
    return dec.reshape(B, -1, C), p


if __name__ == "__main__":
    key = jax.random.PRNGKey(0)

    num_classes = 80
    anchors = jnp.array([[116., 90.], [156., 198.], [373., 326.]],
                        dtype=jnp.float32)                 # (A=3, 2)
    stride = 32
    B, H, W = 2, 8, 8
    A = anchors.shape[0]
    C = num_classes + 5

    x = jax.random.normal(key, (B, A * C, H, W), dtype=jnp.float32)

    pred_result, pred_perm = yolo_layer_forward(
        x, anchors, num_classes, stride, training=False)
    jax.block_until_ready((pred_result, pred_perm))

    ref_result, ref_perm = _reference_forward(x, anchors, num_classes, stride)
    assert pred_result.shape == (B, A * H * W, C)
    assert pred_perm.shape == (B, A, H, W, C)
    assert jnp.allclose(pred_result, ref_result, atol=1e-4, rtol=1e-4)
    assert jnp.allclose(pred_perm.astype(jnp.float32), ref_perm, atol=1e-5, rtol=1e-5)

    print("KERNEL_OK")
</pallas_src>

<mosaic_0001>
module attributes {stable_mosaic.version = 11 : i64} {
  func.func @_yolo_fused_kernel(%arg0: i32, %arg1: i32, %arg2: memref<2x1x85x64xf32, #tpu.memory_space<vmem>>, %arg3: memref<64x85xf32, #tpu.memory_space<vmem>>, %arg4: memref<3x1x85xf32, #tpu.memory_space<vmem>>, %arg5: memref<2x1x64x85xf32, #tpu.memory_space<vmem>>, %arg6: memref<2x1x64x85xf32, #tpu.memory_space<vmem>>, %arg7: memref<128x128xf32, #tpu.memory_space<vmem>>) attributes {dimension_semantics = [#tpu.dimension_semantics<parallel>, #tpu.dimension_semantics<parallel>], iteration_bounds = array<i64: 1, 3>, scalar_prefetch = 0 : i64, scratch_operands = 1 : i64, tpu.core_type = #tpu.core_type<tc>, window_params = [{transform_indices = @transform_0, window_bounds = array<i64: 2, 1, 85, 64>}, {pipeline_mode = #tpu.pipeline_mode<synchronous>, transform_indices = @transform_1, window_bounds = array<i64: 64, 85>}, {pipeline_mode = #tpu.pipeline_mode<synchronous>, transform_indices = @transform_2, window_bounds = array<i64: 3, 1, 85>}, {transform_indices = @transform_3, window_bounds = array<i64: 2, 1, 64, 85>}, {transform_indices = @transform_4, window_bounds = array<i64: 2, 1, 64, 85>}]} {
    %0 = arith.index_cast %arg1 : i32 to index
    %c0 = arith.constant 0 : index
    %c0_0 = arith.constant 0 : index
    %1 = vector.load %arg4[%0, %c0, %c0_0] : memref<3x1x85xf32, #tpu.memory_space<vmem>>, vector<1x1x85xf32>
    %2 = vector.shape_cast %1 : vector<1x1x85xf32> to vector<1x85xf32>
    %c0_1 = arith.constant 0 : index
    %c0_2 = arith.constant 0 : index
    %c0_3 = arith.constant 0 : index
    %c0_4 = arith.constant 0 : index
    %3 = vector.load %arg2[%c0_1, %c0_2, %c0_3, %c0_4] : memref<2x1x85x64xf32, #tpu.memory_space<vmem>>, vector<1x1x85x64xf32>
    %4 = vector.shape_cast %3 : vector<1x1x85x64xf32> to vector<85x64xf32>
    %c0_5 = arith.constant 0 : index
    %c0_6 = arith.constant 0 : index
    %5 = vector.load %arg7[%c0_5, %c0_6] : memref<128x128xf32, #tpu.memory_space<vmem>>, vector<85x64xf32>
    tpu.vector_store %arg7[%c0_5, %c0_6], %4 {strides = array<i32>} : memref<128x128xf32, #tpu.memory_space<vmem>>, vector<85x64xf32>,
    %c0_7 = arith.constant 0 : index
    %c0_8 = arith.constant 0 : index
    %6 = vector.load %arg7[%c0_7, %c0_8] : memref<128x128xf32, #tpu.memory_space<vmem>>, vector<128x128xf32>
    %7 = tpu.transpose %6, [1, 0] : vector<128x128xf32> -> vector<128x128xf32>
    %8 = vector.extract_strided_slice %7 {offsets = [0, 0], sizes = [64, 85], strides = [1, 1]} : vector<128x128xf32> to vector<64x85xf32>
    %c0_9 = arith.constant 0 : index
    %c0_10 = arith.constant 0 : index
    %c0_11 = arith.constant 0 : index
    %c0_12 = arith.constant 0 : index
    %9 = vector.load %arg6[%c0_9, %c0_10, %c0_11, %c0_12] : memref<2x1x64x85xf32, #tpu.memory_space<vmem>>, vector<1x1x64x85xf32>
    %10 = vector.shape_cast %9 : vector<1x1x64x85xf32> to vector<64x85xf32>
    %11 = vector.shape_cast %8 : vector<64x85xf32> to vector<1x1x64x85xf32>
    tpu.vector_store %arg6[%c0_9, %c0_10, %c0_11, %c0_12], %11 {strides = array<i32>} : memref<2x1x64x85xf32, #tpu.memory_space<vmem>>, vector<1x1x64x85xf32>,
    %cst = arith.constant 0.000000e+00 : f32
    %12 = vector.broadcast %cst : f32 to vector<64x85xf32>
    %13 = arith.subf %12, %8 : vector<64x85xf32>
    %14 = math.exp %13 : vector<64x85xf32>
    %cst_13 = arith.constant 1.000000e+00 : f32
    %15 = vector.broadcast %cst_13 : f32 to vector<64x85xf32>
    %16 = arith.addf %15, %14 : vector<64x85xf32>
    %17 = tpu.reciprocal %16 : vector<64x85xf32> -> vector<64x85xf32>
    %18 = tpu.reciprocal %14 : vector<64x85xf32> -> vector<64x85xf32>
    %19 = tpu.iota {dimensions = array<i32: 1>} : vector<64x85xi32>
    %c2_i32 = arith.constant 2 : i32
    %20 = vector.broadcast %c2_i32 : i32 to vector<64x85xi32>
    %21 = arith.cmpi sge, %19, %20 : vector<64x85xi32>
    %c4_i32 = arith.constant 4 : i32
    %22 = vector.broadcast %c4_i32 : i32 to vector<64x85xi32>
    %23 = arith.cmpi slt, %19, %22 : vector<64x85xi32>
    %24 = arith.andi %21, %23 : vector<64x85xi1>
    %25 = arith.select %24, %18, %17 : vector<64x85xi1>, vector<64x85xf32>
    %26 = vector.broadcast %2 : vector<1x85xf32> to vector<64x85xf32>
    %27 = arith.mulf %25, %26 : vector<64x85xf32>
    %c0_14 = arith.constant 0 : index
    %c0_15 = arith.constant 0 : index
    %28 = vector.load %arg3[%c0_14, %c0_15] : memref<64x85xf32, #tpu.memory_space<vmem>>, vector<64x85xf32>
    %29 = arith.addf %27, %28 : vector<64x85xf32>
    %c0_16 = arith.constant 0 : index
    %c0_17 = arith.constant 0 : index
    %c0_18 = arith.constant 0 : index
    %c0_19 = arith.constant 0 : index
    %30 = vector.load %arg5[%c0_16, %c0_17, %c0_18, %c0_19] : memref<2x1x64x85xf32, #tpu.memory_space<vmem>>, vector<1x1x64x85xf32>
    %31 = vector.shape_cast %30 : vector<1x1x64x85xf32> to vector<64x85xf32>
    %32 = vector.shape_cast %29 : vector<64x85xf32> to vector<1x1x64x85xf32>
    tpu.vector_store %arg5[%c0_16, %c0_17, %c0_18, %c0_19], %32 {strides = array<i32>} : memref<2x1x64x85xf32, #tpu.memory_space<vmem>>, vector<1x1x64x85xf32>,
    %c1 = arith.constant 1 : index
    %c0_20 = arith.constant 0 : index
    %c0_21 = arith.constant 0 : index
    %c0_22 = arith.constant 0 : index
    %33 = vector.load %arg2[%c1, %c0_20, %c0_21, %c0_22] : memref<2x1x85x64xf32, #tpu.memory_space<vmem>>, vector<1x1x85x64xf32>
    %34 = vector.shape_cast %33 : vector<1x1x85x64xf32> to vector<85x64xf32>
    %c0_23 = arith.constant 0 : index
    %c0_24 = arith.constant 0 : index
    %35 = vector.load %arg7[%c0_23, %c0_24] : memref<128x128xf32, #tpu.memory_space<vmem>>, vector<85x64xf32>
    tpu.vector_store %arg7[%c0_23, %c0_24], %34 {strides = array<i32>} : memref<128x128xf32, #tpu.memory_space<vmem>>, vector<85x64xf32>,
    %c0_25 = arith.constant 0 : index
    %c0_26 = arith.constant 0 : index
    %36 = vector.load %arg7[%c0_25, %c0_26] : memref<128x128xf32, #tpu.memory_space<vmem>>, vector<128x128xf32>
    %37 = tpu.transpose %36, [1, 0] : vector<128x128xf32> -> vector<128x128xf32>
    %38 = vector.extract_strided_slice %37 {offsets = [0, 0], sizes = [64, 85], strides = [1, 1]} : vector<128x128xf32> to vector<64x85xf32>
    %c1_27 = arith.constant 1 : index
    %c0_28 = arith.constant 0 : index
    %c0_29 = arith.constant 0 : index
    %c0_30 = arith.constant 0 : index
    %39 = vector.load %arg6[%c1_27, %c0_28, %c0_29, %c0_30] : memref<2x1x64x85xf32, #tpu.memory_space<vmem>>, vector<1x1x64x85xf32>
    %40 = vector.shape_cast %39 : vector<1x1x64x85xf32> to vector<64x85xf32>
    %41 = vector.shape_cast %38 : vector<64x85xf32> to vector<1x1x64x85xf32>
    tpu.vector_store %arg6[%c1_27, %c0_28, %c0_29, %c0_30], %41 {strides = array<i32>} : memref<2x1x64x85xf32, #tpu.memory_space<vmem>>, vector<1x1x64x85xf32>,
    %cst_31 = arith.constant 0.000000e+00 : f32
    %42 = vector.broadcast %cst_31 : f32 to vector<64x85xf32>
    %43 = arith.subf %42, %38 : vector<64x85xf32>
    %44 = math.exp %43 : vector<64x85xf32>
    %cst_32 = arith.constant 1.000000e+00 : f32
    %45 = vector.broadcast %cst_32 : f32 to vector<64x85xf32>
    %46 = arith.addf %45, %44 : vector<64x85xf32>
    %47 = tpu.reciprocal %46 : vector<64x85xf32> -> vector<64x85xf32>
    %48 = tpu.reciprocal %44 : vector<64x85xf32> -> vector<64x85xf32>
    %49 = tpu.iota {dimensions = array<i32: 1>} : vector<64x85xi32>
    %c2_i32_33 = arith.constant 2 : i32
    %50 = vector.broadcast %c2_i32_33 : i32 to vector<64x85xi32>
    %51 = arith.cmpi sge, %49, %50 : vector<64x85xi32>
    %c4_i32_34 = arith.constant 4 : i32
    %52 = vector.broadcast %c4_i32_34 : i32 to vector<64x85xi32>
    %53 = arith.cmpi slt, %49, %52 : vector<64x85xi32>
    %54 = arith.andi %51, %53 : vector<64x85xi1>
    %55 = arith.select %54, %48, %47 : vector<64x85xi1>, vector<64x85xf32>
    %56 = vector.broadcast %2 : vector<1x85xf32> to vector<64x85xf32>
    %57 = arith.mulf %55, %56 : vector<64x85xf32>
    %c0_35 = arith.constant 0 : index
    %c0_36 = arith.constant 0 : index
    %58 = vector.load %arg3[%c0_35, %c0_36] : memref<64x85xf32, #tpu.memory_space<vmem>>, vector<64x85xf32>
    %59 = arith.addf %57, %58 : vector<64x85xf32>
    %c1_37 = arith.constant 1 : index
    %c0_38 = arith.constant 0 : index
    %c0_39 = arith.constant 0 : index
    %c0_40 = arith.constant 0 : index
    %60 = vector.load %arg5[%c1_37, %c0_38, %c0_39, %c0_40] : memref<2x1x64x85xf32, #tpu.memory_space<vmem>>, vector<1x1x64x85xf32>
    %61 = vector.shape_cast %60 : vector<1x1x64x85xf32> to vector<64x85xf32>
    %62 = vector.shape_cast %59 : vector<64x85xf32> to vector<1x1x64x85xf32>
    tpu.vector_store %arg5[%c1_37, %c0_38, %c0_39, %c0_40], %62 {strides = array<i32>} : memref<2x1x64x85xf32, #tpu.memory_space<vmem>>, vector<1x1x64x85xf32>,
    return
  }
  func.func @transform_0(%arg0: i32, %arg1: i32) -> (i32, i32, i32, i32) {
    %c0_i32 = arith.constant 0 : i32
    %c0_i32_0 = arith.constant 0 : i32
    %c0_i32_1 = arith.constant 0 : i32
    return %arg0, %arg1, %c0_i32, %c0_i32_0 : i32, i32, i32, i32
  }
  func.func @transform_1(%arg0: i32, %arg1: i32) -> (i32, i32) {
    %c0_i32 = arith.constant 0 : i32
    %c0_i32_0 = arith.constant 0 : i32
    %c0_i32_1 = arith.constant 0 : i32
    return %c0_i32, %c0_i32_0 : i32, i32
  }
  func.func @transform_2(%arg0: i32, %arg1: i32) -> (i32, i32, i32) {
    %c0_i32 = arith.constant 0 : i32
    %c0_i32_0 = arith.constant 0 : i32
    %c0_i32_1 = arith.constant 0 : i32
    %c0_i32_2 = arith.constant 0 : i32
    return %c0_i32, %c0_i32_0, %c0_i32_1 : i32, i32, i32
  }
  func.func @transform_3(%arg0: i32, %arg1: i32) -> (i32, i32, i32, i32) {
    %c0_i32 = arith.constant 0 : i32
    %c0_i32_0 = arith.constant 0 : i32
    %c0_i32_1 = arith.constant 0 : i32
    return %arg0, %arg1, %c0_i32, %c0_i32_0 : i32, i32, i32, i32
  }
  func.func @transform_4(%arg0: i32, %arg1: i32) -> (i32, i32, i32, i32) {
    %c0_i32 = arith.constant 0 : i32
    %c0_i32_0 = arith.constant 0 : i32
    %c0_i32_1 = arith.constant 0 : i32
    return %arg0, %arg1, %c0_i32, %c0_i32_0 : i32, i32, i32, i32
  }
}

module attributes {stable_mosaic.version = 11 : i64} {
  func.func @_yolo_rowmajor_kernel(%arg0: i32, %arg1: i32, %arg2: memref<1x1x64x85xf32, #tpu.memory_space<vmem>>, %arg3: memref<64x85xf32, #tpu.memory_space<vmem>>, %arg4: memref<1x1x85xf32, #tpu.memory_space<vmem>>, %arg5: memref<1x1x64x85xf32, #tpu.memory_space<vmem>>) attributes {dimension_semantics = [#tpu.dimension_semantics<parallel>, #tpu.dimension_semantics<parallel>], iteration_bounds = array<i64: 2, 3>, scalar_prefetch = 0 : i64, scratch_operands = 0 : i64, tpu.core_type = #tpu.core_type<tc>, window_params = [{transform_indices = @transform_0, window_bounds = array<i64: 1, 1, 64, 85>}, {pipeline_mode = #tpu.pipeline_mode<synchronous>, transform_indices = @transform_1, window_bounds = array<i64: 64, 85>}, {transform_indices = @transform_2, window_bounds = array<i64: 1, 1, 85>}, {transform_indices = @transform_3, window_bounds = array<i64: 1, 1, 64, 85>}]} {
    %c0 = arith.constant 0 : index
    %c0_0 = arith.constant 0 : index
    %c0_1 = arith.constant 0 : index
    %c0_2 = arith.constant 0 : index
    %0 = vector.load %arg2[%c0, %c0_0, %c0_1, %c0_2] : memref<1x1x64x85xf32, #tpu.memory_space<vmem>>, vector<1x1x64x85xf32>
    %1 = vector.shape_cast %0 : vector<1x1x64x85xf32> to vector<64x85xf32>
    %2 = arith.negf %1 : vector<64x85xf32>
    %3 = math.exp %2 : vector<64x85xf32>
    %cst = arith.constant 1.000000e+00 : f32
    %4 = vector.broadcast %cst : f32 to vector<64x85xf32>
    %5 = arith.addf %4, %3 : vector<64x85xf32>
    %6 = arith.divf %4, %5 : vector<64x85xf32>
    %7 = tpu.iota {dimensions = array<i32: 1>} : vector<64x85xi32>
    %c2_i32 = arith.constant 2 : i32
    %8 = vector.broadcast %c2_i32 : i32 to vector<64x85xi32>
    %9 = arith.cmpi sge, %7, %8 : vector<64x85xi32>
    %c4_i32 = arith.constant 4 : i32
    %10 = vector.broadcast %c4_i32 : i32 to vector<64x85xi32>
    %11 = arith.cmpi slt, %7, %10 : vector<64x85xi32>
    %12 = arith.andi %9, %11 : vector<64x85xi1>
    %cst_3 = arith.constant 0.000000e+00 : f32
    %13 = vector.broadcast %cst_3 : f32 to vector<64x85xf32>
    %14 = arith.select %12, %1, %13 : vector<64x85xi1>, vector<64x85xf32>
    %15 = math.exp %14 : vector<64x85xf32>
    %16 = arith.select %12, %15, %6 : vector<64x85xi1>, vector<64x85xf32>
    %c0_4 = arith.constant 0 : index
    %c0_5 = arith.constant 0 : index
    %c0_6 = arith.constant 0 : index
    %17 = vector.load %arg4[%c0_4, %c0_5, %c0_6] : memref<1x1x85xf32, #tpu.memory_space<vmem>>, vector<1x1x85xf32>
    %18 = vector.shape_cast %17 : vector<1x1x85xf32> to vector<1x85xf32>
    %19 = vector.broadcast %18 : vector<1x85xf32> to vector<64x85xf32>
    %20 = arith.mulf %16, %19 : vector<64x85xf32>
    %c0_7 = arith.constant 0 : index
    %c0_8 = arith.constant 0 : index
    %21 = vector.load %arg3[%c0_7, %c0_8] : memref<64x85xf32, #tpu.memory_space<vmem>>, vector<64x85xf32>
    %22 = arith.addf %20, %21 : vector<64x85xf32>
    %c0_9 = arith.constant 0 : index
    %c0_10 = arith.constant 0 : index
    %c0_11 = arith.constant 0 : index
    %c0_12 = arith.constant 0 : index
    %23 = vector.load %arg5[%c0_9, %c0_10, %c0_11, %c0_12] : memref<1x1x64x85xf32, #tpu.memory_space<vmem>>, vector<1x1x64x85xf32>
    %24 = vector.shape_cast %23 : vector<1x1x64x85xf32> to vector<64x85xf32>
    %25 = vector.shape_cast %22 : vector<64x85xf32> to vector<1x1x64x85xf32>
    tpu.vector_store %arg5[%c0_9, %c0_10, %c0_11, %c0_12], %25 {strides = array<i32>} : memref<1x1x64x85xf32, #tpu.memory_space<vmem>>, vector<1x1x64x85xf32>,
    return
  }
  func.func @transform_0(%arg0: i32, %arg1: i32) -> (i32, i32, i32, i32) {
    %c0_i32 = arith.constant 0 : i32
    %c0_i32_0 = arith.constant 0 : i32
    %c0_i32_1 = arith.constant 0 : i32
    return %arg0, %arg1, %c0_i32, %c0_i32_0 : i32, i32, i32, i32
  }
  func.func @transform_1(%arg0: i32, %arg1: i32) -> (i32, i32) {
    %c0_i32 = arith.constant 0 : i32
    %c0_i32_0 = arith.constant 0 : i32
    %c0_i32_1 = arith.constant 0 : i32
    return %c0_i32, %c0_i32_0 : i32, i32
  }
  func.func @transform_2(%arg0: i32, %arg1: i32) -> (i32, i32, i32) {
    %c0_i32 = arith.constant 0 : i32
    %c0_i32_0 = arith.constant 0 : i32
    %c0_i32_1 = arith.constant 0 : i32
    return %arg1, %c0_i32, %c0_i32_0 : i32, i32, i32
  }
  func.func @transform_3(%arg0: i32, %arg1: i32) -> (i32, i32, i32, i32) {
    %c0_i32 = arith.constant 0 : i32
    %c0_i32_0 = arith.constant 0 : i32
    %c0_i32_1 = arith.constant 0 : i32
    return %arg0, %arg1, %c0_i32, %c0_i32_0 : i32, i32, i32, i32
  }
}

</mosaic_0001>

<bundles_post_ra>
// kernel: tpu_custom_call.1
= control target key start
LH: loop header
LB: loop body
LE: loop exit
PB: predicated region body
PF: predicated region fallthrough
CT: control target
= control target key end

     0   :  { %10 = vsyncpa [#allocation5], 0  ;;  %s1615_s0 = inlined_call_operand.vmem [shape: f32[2,3,85,64], index: 0, kind: input, shape index: {}]   ;;  %s1616_s1 = inlined_call_operand.vmem [shape: f32[64,85], index: 1, kind: input, shape index: {}]   ;;  %s1617_s2 = inlined_call_operand.vmem [shape: f32[3,1,85], index: 2, kind: input, shape index: {}]   ;;  %s1618_s3 = inlined_call_operand.hbm [shape: f32[2,3,64,85], index: 3, kind: output, shape index: {0}]   ;;  %s1619_s4 = inlined_call_operand.hbm [shape: f32[2,3,64,85], index: 4, kind: output, shape index: {1}]  }
   0x1   :  { %12 = vsyncpa [#allocation5 + $0x1], 0 }
   0x2   :  { %13 = vsyncpa [#allocation7], 0 }
   0x3   :  { %15 = vsyncpa [#allocation7 + $0x1], 0  ;;  %s1229_s15 = smov 0   ;;  %s1231_s16 = smov 0  }
   0x4   :  { %s1233_s17 = smov 0   ;;  %s1235_s18 = smov 0  }
   0x5   :  { %s1237_s19 = smov 0   ;;  %s1239_s20 = smov 0  }
   0x6 LB: > { %s907_s21 = sadd.s32 4294967295, %s1190_s20   ;;  %s908_s22 = sadd.s32 4294967294, %s1190_s20   ;;  %s1190_s20 = sphi %s1239_s20, %s21_s20   ;;  %s1186_s19 = sphi %s1237_s19, %s1628_s19   ;;  %s1182_s18 = sphi %s1235_s18, %s1627_s18   ;;  %s1178_s17 = sphi %s1233_s17, %s1626_s17   ;;  %s1174_s16 = sphi %s1231_s16, %s1625_s16   ;;  %s1170_s15 = sphi %s1229_s15, %s1624_s15  }
   0x7   : > { %s30_s23 = sadd.s32 1, %s1186_s19  ;;  %s42_s24 = sadd.s32 1, %s1178_s17 }
   0x8   : > { %p31_p0 = scmp.ge.s32.totalorder %s30_s23, 3  ;;  %p49_p1 = scmp.ne.s32.totalorder %s1178_s17, %s1174_s16 }
   0x9   : > { %p50_p2 = scmp.eq.s32.totalorder %s1190_s20, 0  ;;  %p123_p3 = scmp.eq.s32.totalorder %s907_s21, 2 }
   0xa   : > { %s1630_s23 = smov (%p31_p0, %s30_s23), 0  ;;  %p128_p6 = scmp.ne.s32.totalorder %s1174_s16, %s1170_s15 }
   0xb   : > { %p51_p4 = por %p50_p2, %p49_p1  ;;  %p1268_p5 = por %p123_p3, %p49_p1 }
   0xc   : > { %s38_s26 = ssub.s32 %s1186_s19, %s1630_s23  ;;  %p129_p8 = scmp.eq.s32.totalorder %s908_s22, 2 }
   0xd   : > { %p40_p7 = scmp.eq.s32.totalorder %s38_s26, 0  ;;  %p910_p10 = scmp.ge.s32.totalorder %s1190_s20, 3 }
   0xe   : > { %p1279_p9 = por %p129_p8, %p128_p6 }
   0xf   : > { %s1277_s27 = scalar_select %p40_p7, %s1178_s17, %s42_s24  }
  0x10   : > { %179 = sbr.rel (%p910_p10) target bundleno = 37 (0x25), region = 24 }
  0x15   : > { %182 = sbr.rel (!%p51_p4) target bundleno = 37 (0x25), region = 28  ;;  %s184_s29 = sand.u32 (%p51_p4), 1, %s1178_s17  }
  0x16   : > { %s954_s30 = smul.u32 (%p51_p4), 88, %s1186_s19 }
  0x17   : > { %s953_s5 = smul.u32 (%p51_p4), 176, %s184_s29 }
  0x18   : > { %s1289_s8 = scalar_lea.vmem (%p51_p4), %s1615_s0, %s954_s30 }
  0x19   : > { %v263_v0 = vld [vmem:[%s1289_s8] sm:$0xff] (%p51_p4)  ;;  %v265_v1 = vld [vmem:[%s1289_s8 + $0x8] sm:$0xff] (%p51_p4)  ;;  %v267_v2 = vld [vmem:[%s1289_s8 + $0x10] sm:$0xff] (%p51_p4)  ;;  %s1294_s9 = scalar_lea.vmem (%p51_p4), [#allocation3], %s953_s5 }
  0x1a   : > { %264 = vst [vmem:[%s1294_s9] sm:$0xff] %v263_v0  ;;  %266 = vst [vmem:[%s1294_s9 + $0x8] sm:$0xff] %v265_v1  ;;  %v269_v3 = vld [vmem:[%s1289_s8 + $0x18] sm:$0xff]  ;;  %v271_v4 = vld [vmem:[%s1289_s8 + $0x20] sm:$0xff] }
  0x1b   : > { %268 = vst [vmem:[%s1294_s9 + $0x10] sm:$0xff] %v267_v2  ;;  %v273_v5 = vld [vmem:[%s1289_s8 + $0x28] sm:$0xff]  ;;  %270 = vst [vmem:[%s1294_s9 + $0x18] sm:$0xff] %v269_v3  ;;  %v275_v6 = vld [vmem:[%s1289_s8 + $0x30] sm:$0xff] }
  0x1c   : > { %272 = vst [vmem:[%s1294_s9 + $0x20] sm:$0xff] %v271_v4  ;;  %274 = vst [vmem:[%s1294_s9 + $0x28] sm:$0xff] %v273_v5  ;;  %v277_v7 = vld [vmem:[%s1289_s8 + $0x38] sm:$0xff]  ;;  %v279_v8 = vld [vmem:[%s1289_s8 + $0x40] sm:$0xff] }
  0x1d   : > { %276 = vst [vmem:[%s1294_s9 + $0x30] sm:$0xff] %v275_v6  ;;  %278 = vst [vmem:[%s1294_s9 + $0x38] sm:$0xff] %v277_v7  ;;  %v281_v9 = vld [vmem:[%s1289_s8 + $0x48] sm:$0xff]  ;;  %v283_v10 = vld [vmem:[%s1289_s8 + $0x50] sm:$0xff] }
  0x1e   : > { %280 = vst [vmem:[%s1294_s9 + $0x40] sm:$0xff] %v279_v8  ;;  %v285_v11 = vld [vmem:[%s1289_s8 + $0x108] sm:$0xff]  ;;  %282 = vst [vmem:[%s1294_s9 + $0x48] sm:$0xff] %v281_v9  ;;  %v287_v12 = vld [vmem:[%s1289_s8 + $0x110] sm:$0xff] }
  0x1f   : > { %284 = vst [vmem:[%s1294_s9 + $0x50] sm:$0xff] %v283_v10  ;;  %286 = vst [vmem:[%s1294_s9 + $0x58] sm:$0xff] %v285_v11  ;;  %v289_v13 = vld [vmem:[%s1289_s8 + $0x118] sm:$0xff]  ;;  %v291_v14 = vld [vmem:[%s1289_s8 + $0x120] sm:$0xff] }
  0x20   : > { %288 = vst [vmem:[%s1294_s9 + $0x60] sm:$0xff] %v287_v12  ;;  %290 = vst [vmem:[%s1294_s9 + $0x68] sm:$0xff] %v289_v13  ;;  %v293_v15 = vld [vmem:[%s1289_s8 + $0x128] sm:$0xff]  ;;  %v295_v16 = vld [vmem:[%s1289_s8 + $0x130] sm:$0xff] }
  0x21   : > { %292 = vst [vmem:[%s1294_s9 + $0x70] sm:$0xff] %v291_v14  ;;  %v297_v17 = vld [vmem:[%s1289_s8 + $0x138] sm:$0xff]  ;;  %294 = vst [vmem:[%s1294_s9 + $0x78] sm:$0xff] %v293_v15  ;;  %v299_v18 = vld [vmem:[%s1289_s8 + $0x140] sm:$0xff] }
  0x22   : > { %296 = vst [vmem:[%s1294_s9 + $0x80] sm:$0xff] %v295_v16  ;;  %298 = vst [vmem:[%s1294_s9 + $0x88] sm:$0xff] %v297_v17  ;;  %v301_v19 = vld [vmem:[%s1289_s8 + $0x148] sm:$0xff]  ;;  %v303_v20 = vld [vmem:[%s1289_s8 + $0x150] sm:$0xff] }
  0x23   : > { %300 = vst [vmem:[%s1294_s9 + $0x90] sm:$0xff] %v299_v18  ;;  %302 = vst [vmem:[%s1294_s9 + $0x98] sm:$0xff] %v301_v19  ;;  %v305_v21 = vld [vmem:[%s1289_s8 + $0x158] sm:$0xff] }
  0x24   : > { %304 = vst [vmem:[%s1294_s9 + $0xa0] sm:$0xff] %v303_v20  ;;  %306 = vst [vmem:[%s1294_s9 + $0xa8] sm:$0xff] %v305_v21 }
  0x25 PF: > { %p912_p11 = scmp.ge.s32.totalorder %s1190_s20, 1  ;;  %p311_p12 = scmp.lt.s32.totalorder %s1190_s20, 4 }
  0x27   : > { %p312_p13 = pnand %p912_p11, %p311_p12 }
  0x28   : > { %s1340_s10 = sand.u32 (!%p312_p13), 1, %s1174_s16   ;;  %s351_s24 = scalar_lea.vmem (!%p312_p13), %s1617_s2, %s1182_s18 }
  0x29   : > { %315 = sbr.rel (%p312_p13) target bundleno = 283 (0x11b), region = 66  ;;  %s913_s13 = sshll.u32 (!%p312_p13), %s1340_s10, 7 }
  0x2a   : > { %s955_s11 = smul.u32 (!%p312_p13), 176, %s1340_s10  ;;  %s1392_s14 = scalar_lea.vmem (!%p312_p13), [#allocation6], %s913_s13 }
  0x2b   : > { %s1457_s6 = scalar_lea.vmem (!%p312_p13), [#allocation4], %s913_s13  ;;  %s703_s5 = scalar_lea.sflag (!%p312_p13), [#allocation5], %s1340_s10 }
  0x2c   : > { %s1343_s12 = scalar_lea.vmem (!%p312_p13), [#allocation3], %s955_s11  ;;  %s708_s7 = scalar_lea.sflag (!%p312_p13), [#allocation7], %s1340_s10 }
  0x2e   : > { %vm364_vm0 = vcmask 523264   ;;  %v353_v22 = vld [vmem:[%s1343_s12] sm:$0xff]  ;;  %v354_v23 = vld [vmem:[%s1343_s12 + $0x8] sm:$0xff]  ;;  %v355_v24 = vld [vmem:[%s1343_s12 + $0x10] sm:$0xff]  ;;  %vm375_vm1 = vcmask 520192   ;;  %vm425_vm2 = vcmask 695296  }
  0x2f   : > { %365 = vst.msk [vmem:[#allocation2] sm:$0xff] %vm364_vm0, %v353_v22  ;;  %366 = vst.msk [vmem:[#allocation2 + $0x8] sm:$0xff] %vm364_vm0, %v354_v23  ;;  %v356_v25 = vld [vmem:[%s1343_s12 + $0x18] sm:$0xff]  ;;  %v357_v26 = vld [vmem:[%s1343_s12 + $0x20] sm:$0xff] }
  0x30   : > { %367 = vst.msk [vmem:[#allocation2 + $0x10] sm:$0xff] %vm364_vm0, %v355_v24  ;;  %368 = vst.msk [vmem:[#allocation2 + $0x18] sm:$0xff] %vm364_vm0, %v356_v25  ;;  %v358_v27 = vld [vmem:[%s1343_s12 + $0x28] sm:$0xff]  ;;  %v359_v28 = vld [vmem:[%s1343_s12 + $0x30] sm:$0xff] }
  0x31   : > { %369 = vst.msk [vmem:[#allocation2 + $0x20] sm:$0xff] %vm364_vm0, %v357_v26  ;;  %370 = vst.msk [vmem:[#allocation2 + $0x28] sm:$0xff] %vm364_vm0, %v358_v27  ;;  %v360_v29 = vld [vmem:[%s1343_s12 + $0x38] sm:$0xff]  ;;  %v361_v31 = vld [vmem:[%s1343_s12 + $0x40] sm:$0xff] }
  0x32   : > { %v916_v30 = vld [vmem:[%s1343_s12 + $0x58] sm:$0xff]  ;;  %371 = vst.msk [vmem:[#allocation2 + $0x30] sm:$0xff] %vm364_vm0, %v359_v28  ;;  %372 = vst.msk [vmem:[#allocation2 + $0x38] sm:$0xff] %vm364_vm0, %v360_v29  ;;  %v917_v32 = vld [vmem:[%s1343_s12 + $0x60] sm:$0xff] }
  0x33   : > { %373 = vst.msk [vmem:[#allocation2 + $0x40] sm:$0xff] %vm364_vm0, %v361_v31  ;;  %v362_v33 = vld [vmem:[%s1343_s12 + $0x48] sm:$0xff]  ;;  %v363_v34 = vld [vmem:[%s1343_s12 + $0x50] sm:$0x1f]  ;;  %v920_v39 = vld [vmem:[%s1343_s12 + $0x78] sm:$0xff] }
  0x34   : > { %v918_v35 = vld [vmem:[%s1343_s12 + $0x68] sm:$0xff]  ;;  %v919_v36 = vld [vmem:[%s1343_s12 + $0x70] sm:$0xff]  ;;  %374 = vst.msk [vmem:[#allocation2 + $0x48] sm:$0xff] %vm364_vm0, %v362_v33  ;;  %v921_v41 = vld [vmem:[%s1343_s12 + $0x80] sm:$0xff] }
  0x35   : > { %376 = vst.msk [vmem:[#allocation2 + $0x50] sm:$0x1f] %vm375_vm1, %v363_v34  ;;  %v922_v42 = vld [vmem:[%s1343_s12 + $0x88] sm:$0xff]  ;;  %v923_v45 = vld [vmem:[%s1343_s12 + $0x90] sm:$0xff]  ;;  %v924_v47 = vld [vmem:[%s1343_s12 + $0x98] sm:$0xff] }
  0x36   : > { %v377_v37 = vld [vmem:[#allocation2] sm:$0xff]  ;;  %v378_v38 = vld [vmem:[#allocation2 + $0x8] sm:$0xff]  ;;  %v388_v1 = vld [vmem:[#allocation2 + $0x58] sm:$0xff] }
  0x37   : > { %393 = vxpose.xlu0.b32.start [1/16] (narrow) %v377_v37, 64  ;;  %545 = vst.msk [vmem:[#allocation2] sm:$0xff] %vm364_vm0, %v916_v30  ;;  %546 = vst.msk [vmem:[#allocation2 + $0x8] sm:$0xff] %vm364_vm0, %v917_v32  ;;  %v379_v40 = vld [vmem:[#allocation2 + $0x10] sm:$0xff]  ;;  %v380_v43 = vld [vmem:[#allocation2 + $0x18] sm:$0xff] }
  0x38   : > { %547 = vst.msk [vmem:[#allocation2 + $0x10] sm:$0xff] %vm364_vm0, %v918_v35  ;;  %v381_v44 = vld [vmem:[#allocation2 + $0x20] sm:$0xff]  ;;  %548 = vst.msk [vmem:[#allocation2 + $0x18] sm:$0xff] %vm364_vm0, %v919_v36  ;;  %v382_v46 = vld [vmem:[#allocation2 + $0x28] sm:$0xff]  ;;  %v482_v35 = vlaneseq }
  0x39   : > { %549 = vst.msk [vmem:[#allocation2 + $0x20] sm:$0xff] %vm364_vm0, %v920_v39  ;;  %v925_v48 = vld [vmem:[%s1343_s12 + $0xa0] sm:$0xff]  ;;  %550 = vst.msk [vmem:[#allocation2 + $0x28] sm:$0xff] %vm364_vm0, %v921_v41  ;;  %v384_v50 = vld [vmem:[#allocation2 + $0x38] sm:$0xff] }
  0x3a   : > { %v383_v49 = vld [vmem:[#allocation2 + $0x30] sm:$0xff]  ;;  %v926_v51 = vld [vmem:[%s1343_s12 + $0xa8] sm:$0x1f]  ;;  %552 = vst.msk [vmem:[#allocation2 + $0x38] sm:$0xff] %vm364_vm0, %v923_v45  ;;  %v385_v52 = vld [vmem:[#allocation2 + $0x40] sm:$0xff] }
  0x3b   : > { %394 = vxpose.xlu0.b32.cont [2/16] (narrow) %v378_v38, 64  ;;  %551 = vst.msk [vmem:[#allocation2 + $0x30] sm:$0xff] %vm364_vm0, %v922_v42  ;;  %553 = vst.msk [vmem:[#allocation2 + $0x40] sm:$0xff] %vm364_vm0, %v924_v47  ;;  %v386_v53 = vld [vmem:[#allocation2 + $0x48] sm:$0xff]  ;;  %v389_v3 = vld [vmem:[#allocation2 + $0x60] sm:$0xff]  ;;  %v483_v42 = vand.u32 127, %v482_v35 }
  0x3c   : > { %v387_v54 = vld [vmem:[#allocation2 + $0x50] sm:$0xff]  ;;  %554 = vst.msk [vmem:[#allocation2 + $0x48] sm:$0xff] %vm364_vm0, %v925_v48  ;;  %v390_v4 = vld [vmem:[#allocation2 + $0x68] sm:$0xff]  ;;  %v392_v6 = vld [vmem:[#allocation2 + $0x78] sm:$0xff] }
  0x3d   : > { %555 = vst.msk [vmem:[#allocation2 + $0x50] sm:$0x1f] %vm375_vm1, %v926_v51  ;;  %v391_v5 = vld [vmem:[#allocation2 + $0x70] sm:$0xff]  ;;  %vm484_vm3 = vcmp.ge.s32.totalorder %v483_v42, 2  ;;  %vm485_vm4 = vcmp.lt.s32.totalorder %v483_v42, 4 }
  0x3e   : > { %v556_v55 = vld [vmem:[#allocation2] sm:$0xff]  ;;  %v557_v56 = vld [vmem:[#allocation2 + $0x8] sm:$0xff]  ;;  %vm1432_vm5 = vmand %vm484_vm3, %vm485_vm4 }
  0x3f   : > { %572 = vxpose.xlu1.b32.start [1/16] (narrow) %v556_v55, 64  ;;  %395 = vxpose.xlu0.b32.cont [3/16] (narrow) %v379_v40, 64  ;;  %v558_v57 = vld [vmem:[#allocation2 + $0x10] sm:$0xff]  ;;  %v559_v58 = vld [vmem:[#allocation2 + $0x18] sm:$0xff] }
  0x40   : > { %v560_v59 = vld [vmem:[#allocation2 + $0x20] sm:$0xff]  ;;  %v561_v60 = vld [vmem:[#allocation2 + $0x28] sm:$0xff] }
  0x41   : > { %v563_v62 = vld [vmem:[#allocation2 + $0x38] sm:$0xff] }
  0x42   : > { %v562_v61 = vld [vmem:[#allocation2 + $0x30] sm:$0xff]  ;;  %v564_v63 = vld [vmem:[#allocation2 + $0x40] sm:$0xff] }
  0x43   : > { %573 = vxpose.xlu1.b32.cont [2/16] (narrow) %v557_v56, 64  ;;  %396 = vxpose.xlu0.b32.cont [4/16] (narrow) %v380_v43, 64  ;;  %v565_v0 = vld [vmem:[#allocation2 + $0x48] sm:$0xff] }
  0x44   : > { %v566_v2 = vld [vmem:[#allocation2 + $0x50] sm:$0xff] }
  0x47   : > { %574 = vxpose.xlu1.b32.cont [3/16] (narrow) %v558_v57, 64  ;;  %397 = vxpose.xlu0.b32.cont [5/16] (narrow) %v381_v44, 64 }
  0x4b   : > { %575 = vxpose.xlu1.b32.cont [4/16] (narrow) %v559_v58, 64  ;;  %398 = vxpose.xlu0.b32.cont [6/16] (narrow) %v382_v46, 64 }
  0x4f   : > { %576 = vxpose.xlu1.b32.cont [5/16] (narrow) %v560_v59, 64  ;;  %399 = vxpose.xlu0.b32.cont [7/16] (narrow) %v383_v49, 64  ;;  %v1436_v59 = vld [vmem:[%s351_s24] ss:$0 sm:$0xff] }
  0x53   : > { %577 = vxpose.xlu1.b32.cont [6/16] (narrow) %v561_v60, 64  ;;  %400 = vxpose.xlu0.b32.cont [8/16] (narrow) %v384_v50, 64 }
  0x57   : > { %578 = vxpose.xlu1.b32.cont [7/16] (narrow) %v562_v61, 64  ;;  %401 = vxpose.xlu0.b32.cont [9/16] (narrow) %v385_v52, 64 }
  0x5b   : > { %579 = vxpose.xlu1.b32.cont [8/16] (narrow) %v563_v62, 64  ;;  %402 = vxpose.xlu0.b32.cont [10/16] (narrow) %v386_v53, 64 }
  0x5f   : > { %580 = vxpose.xlu1.b32.cont [9/16] (narrow) %v564_v63, 64  ;;  %403 = vxpose.xlu0.b32.cont [11/16] (narrow) %v387_v54, 64  ;;  %v509_v63 = vld [vmem:[%s1616_s1] sm:$0xff] }
  0x63   : > { %581 = vxpose.xlu1.b32.cont [10/16] (narrow) %v565_v0, 64  ;;  %404 = vxpose.xlu0.b32.cont [12/16] (narrow) %v388_v1, 64 }
  0x67   : > { %582 = vxpose.xlu1.b32.cont [11/16] (narrow) %v566_v2, 64  ;;  %405 = vxpose.xlu0.b32.cont [13/16] (narrow) %v389_v3, 64 }
  0x6b   : > { %583 = vxpose.xlu1.b32.cont [12/16] (narrow) %v388_v1, 64  ;;  %406 = vxpose.xlu0.b32.cont [14/16] (narrow) %v390_v4, 64 }
  0x6f   : > { %584 = vxpose.xlu1.b32.cont [13/16] (narrow) %v389_v3, 64  ;;  %407 = vxpose.xlu0.b32.cont [15/16] (narrow) %v391_v5, 64 }
  0x73   : > { %585 = vxpose.xlu1.b32.cont [14/16] (narrow) %v390_v4, 64  ;;  %408 = vxpose.xlu0.b32.end [16/16] (narrow) %v392_v6, 64 }
  0x77   : > { %586 = vxpose.xlu1.b32.cont [15/16] (narrow) %v391_v5, 64 }
  0x7b   : > { %587 = vxpose.xlu1.b32.end [16/16] (narrow) %v392_v6, 64 }
  0xb3   : > { %v409_v7 = vpop.trf.xlu0 }
  0xb4   : > { %426 = vst.msk [vmem:[%s1392_s14] sm:$0xff] %vm425_vm2, %v409_v7  ;;  %v434_v8 = vsub.f32 0.0, %v409_v7 }
  0xb6   : > { %v442_v9 = vmul.f32 1.442695, %v434_v8 }
  0xb7   : > { %v410_v10 = vpop.trf.xlu0 }
  0xb8   : > { %1040 = vpow2.f32 %v442_v9  ;;  %427 = vst.msk [vmem:[%s1392_s14 + $0x8] sm:$0xff] %vm425_vm2, %v410_v10  ;;  %v435_v11 = vsub.f32 0.0, %v410_v10 }
  0xba   : > { %v444_v12 = vmul.f32 1.442695, %v435_v11 }
  0xbb   : > { %v588_v13 = vpop.trf.xlu1  ;;  %v411_v14 = vpop.trf.xlu0 }
  0xbc   : > { %927 = vst.msk [vmem:[%s1392_s14 + $0x40] sm:$0xff] %vm425_vm2, %v588_v13  ;;  %v613_v15 = vsub.f32 0.0, %v588_v13  ;;  %1042 = vpow2.f32 %v444_v12  ;;  %428 = vst.msk [vmem:[%s1392_s14 + $0x10] sm:$0xff] %vm425_vm2, %v411_v14  ;;  %v436_v16 = vsub.f32 0.0, %v411_v14  ;;  %v510_v14 = vld [vmem:[%s1616_s1 + $0x8] sm:$0xff] }
  0xbe   : > { %v621_v17 = vmul.f32 1.442695, %v613_v15  ;;  %v446_v18 = vmul.f32 1.442695, %v436_v16 }
  0xbf   : > { %v589_v19 = vpop.trf.xlu1  ;;  %v412_v20 = vpop.trf.xlu0 }
  0xc0   : > { %1044 = vpow2.f32 %v621_v17  ;;  %928 = vst.msk [vmem:[%s1392_s14 + $0x48] sm:$0xff] %vm425_vm2, %v589_v19  ;;  %v614_v21 = vsub.f32 0.0, %v589_v19  ;;  %429 = vst.msk [vmem:[%s1392_s14 + $0x18] sm:$0xff] %vm425_vm2, %v412_v20  ;;  %v437_v22 = vsub.f32 0.0, %v412_v20 }
  0xc1   : > { %1046 = vpow2.f32 %v446_v18 }
  0xc2   : > { %v623_v23 = vmul.f32 1.442695, %v614_v21  ;;  %v448_v24 = vmul.f32 1.442695, %v437_v22 }
  0xc3   : > { %v590_v25 = vpop.trf.xlu1  ;;  %v413_v26 = vpop.trf.xlu0 }
  0xc4   : > { %1048 = vpow2.f32 %v623_v23  ;;  %929 = vst.msk [vmem:[%s1392_s14 + $0x50] sm:$0xff] %vm425_vm2, %v590_v25  ;;  %v615_v27 = vsub.f32 0.0, %v590_v25  ;;  %430 = vst.msk [vmem:[%s1392_s14 + $0x20] sm:$0xff] %vm425_vm2, %v413_v26  ;;  %v438_v28 = vsub.f32 0.0, %v413_v26 }
  0xc5   : > { %v1041_v29 = vpop.eup %1040  ;;  %1050 = vpow2.f32 %v448_v24 }
  0xc6   : > { %v458_v30 = vadd.f32 1.0, %v1041_v29  ;;  %1052 = vrcp.f32 %v1041_v29  ;;  %v625_v31 = vmul.f32 1.442695, %v615_v27  ;;  %v450_v33 = vmul.f32 1.442695, %v438_v28 }
  0xc7   : > { %v591_v32 = vpop.trf.xlu1  ;;  %v414_v34 = vpop.trf.xlu0 }
  0xc8   : > { %1054 = vrcp.f32 %v458_v30  ;;  %930 = vst.msk [vmem:[%s1392_s14 + $0x58] sm:$0xff] %vm425_vm2, %v591_v32  ;;  %v616_v36 = vsub.f32 0.0, %v591_v32  ;;  %431 = vst.msk [vmem:[%s1392_s14 + $0x28] sm:$0xff] %vm425_vm2, %v414_v34  ;;  %v439_v50 = vsub.f32 0.0, %v414_v34  ;;  %v511_v32 = vld [vmem:[%s1616_s1 + $0x10] sm:$0xff] }
  0xc9   : > { %v1043_v37 = vpop.eup %1042  ;;  %1056 = vpow2.f32 %v625_v31 }
  0xca   : > { %v459_v38 = vadd.f32 1.0, %v1043_v37  ;;  %1058 = vrcp.f32 %v1043_v37  ;;  %v627_v39 = vmul.f32 1.442695, %v616_v36  ;;  %v452_v60 = vmul.f32 1.442695, %v439_v50 }
  0xcb   : > { %1060 = vpow2.f32 %v450_v33  ;;  %v592_v40 = vpop.trf.xlu1  ;;  %v1414_v41 = vpop.trf.xlu0 }
  0xcc   : > { %1062 = vrcp.f32 %v459_v38  ;;  %931 = vst.msk [vmem:[%s1392_s14 + $0x60] sm:$0xff] %vm425_vm2, %v592_v40  ;;  %432 = vst.msk [vmem:[%s1392_s14 + $0x30] sm:$0xff] %vm425_vm2, %v1414_v41  ;;  %v617_v46 = vsub.f32 0.0, %v592_v40  ;;  %v440_v5 = vsub.f32 0.0, %v1414_v41 }
  0xcd   : > { %v1045_v43 = vpop.eup %1044  ;;  %1064 = vpow2.f32 %v627_v39 }
  0xce   : > { %v1047_v44 = vpop.eup %1046  ;;  %v637_v45 = vadd.f32 1.0, %v1045_v43  ;;  %1066 = vrcp.f32 %v1045_v43  ;;  %v629_v54 = vmul.f32 1.442695, %v617_v46  ;;  %v454_v21 = vmul.f32 1.442695, %v440_v5  ;;  %v512_v43 = vld [vmem:[%s1616_s1 + $0x18] sm:$0xff] }
  0xcf   : > { %v460_v47 = vadd.f32 1.0, %v1047_v44  ;;  %1068 = vrcp.f32 %v1047_v44  ;;  %v593_v48 = vpop.trf.xlu1  ;;  %v1421_v49 = vpop.trf.xlu0 }
  0xd0   : > { %1070 = vrcp.f32 %v637_v45  ;;  %932 = vst.msk [vmem:[%s1392_s14 + $0x68] sm:$0xff] %vm425_vm2, %v593_v48  ;;  %433 = vst.msk [vmem:[%s1392_s14 + $0x38] sm:$0xff] %vm425_vm2, %v1421_v49  ;;  %v618_v1 = vsub.f32 0.0, %v593_v48  ;;  %v441_v12 = vsub.f32 0.0, %v1421_v49 }
  0xd1   : > { %v1049_v51 = vpop.eup %1048  ;;  %1072 = vrcp.f32 %v460_v47 }
  0xd2   : > { %v1051_v52 = vpop.eup %1050  ;;  %v638_v53 = vadd.f32 1.0, %v1049_v51  ;;  %1074 = vrcp.f32 %v1049_v51  ;;  %v631_v16 = vmul.f32 1.442695, %v618_v1  ;;  %v456_v26 = vmul.f32 1.442695, %v441_v12 }
  0xd3   : > { %v1053_v55 = vpop.eup %1052  ;;  %v461_v57 = vadd.f32 1.0, %v1051_v52  ;;  %1076 = vrcp.f32 %v1051_v52  ;;  %v594_v58 = vpop.trf.xlu1 }
  0xd4   : > { %1078 = vrcp.f32 %v638_v53  ;;  %933 = vst.msk [vmem:[%s1392_s14 + $0x70] sm:$0xff] %vm425_vm2, %v594_v58  ;;  %v619_v8 = vsub.f32 0.0, %v594_v58 }
  0xd5   : > { %v1055_v61 = vpop.eup %1054  ;;  %1080 = vrcp.f32 %v461_v57 }
  0xd6   : > { %v1057_v62 = vpop.eup %1056  ;;  %v487_v0 = vsel %vm1432_vm5, %v1053_v55, %v1055_v61  ;;  %1082 = vpow2.f32 %v629_v54  ;;  %v633_v23 = vmul.f32 1.442695, %v619_v8 }
  0xd7   : > { %v1059_v2 = vpop.eup %1058  ;;  %v501_v3 = vmul.f32 %v1436_v59, %v487_v0  ;;  %v639_v4 = vadd.f32 1.0, %v1057_v62  ;;  %1084 = vrcp.f32 %v1057_v62  ;;  %v595_v6 = vpop.trf.xlu1  ;;  %v513_v62 = vld [vmem:[%s1616_s1 + $0x20] sm:$0xff] }
  0xd8   : > { %v1061_v7 = vpop.eup %1060  ;;  %1086 = vpow2.f32 %v452_v60  ;;  %934 = vst.msk [vmem:[%s1392_s14 + $0x78] sm:$0xff] %vm425_vm2, %v595_v6  ;;  %v620_v17 = vsub.f32 0.0, %v595_v6 }
  0xd9   : > { %v1063_v9 = vpop.eup %1062  ;;  %v517_v10 = vadd.f32 %v509_v63, %v501_v3  ;;  %1088 = vrcp.f32 %v639_v4  ;;  %v462_v11 = vadd.f32 1.0, %v1061_v7 }
  0xda   : > { %v1065_v13 = vpop.eup %1064  ;;  %v488_v15 = vsel %vm1432_vm5, %v1059_v2, %v1063_v9  ;;  %1090 = vrcp.f32 %v1061_v7  ;;  %v635_v29 = vmul.f32 1.442695, %v620_v17 }
  0xdb   : > { %v1067_v18 = vpop.eup %1066  ;;  %525 = vst.msk [vmem:[%s1457_s6] sm:$0xff] %vm425_vm2, %v517_v10  ;;  %v502_v19 = vmul.f32 %v1436_v59, %v488_v15  ;;  %v640_v20 = vadd.f32 1.0, %v1065_v13  ;;  %1092 = vrcp.f32 %v1065_v13 }
  0xdc   : > { %v1069_v22 = vpop.eup %1068  ;;  %1094 = vrcp.f32 %v462_v11 }
  0xdd   : > { %v1071_v24 = vpop.eup %1070  ;;  %v518_v25 = vadd.f32 %v510_v14, %v502_v19  ;;  %1096 = vrcp.f32 %v640_v20 }
  0xde   : > { %v1073_v27 = vpop.eup %1072  ;;  %v661_v28 = vsel %vm1432_vm5, %v1067_v18, %v1071_v24  ;;  %1098 = vpow2.f32 %v631_v16 }
  0xdf   : > { %v1075_v30 = vpop.eup %1074  ;;  %v669_v31 = vmul.f32 %v1436_v59, %v661_v28  ;;  %526 = vst.msk [vmem:[%s1457_s6 + $0x8] sm:$0xff] %vm425_vm2, %v518_v25  ;;  %v489_v33 = vsel %vm1432_vm5, %v1069_v22, %v1073_v27  ;;  %1100 = vpow2.f32 %v454_v21  ;;  %v514_v21 = vld [vmem:[%s1616_s1 + $0x28] sm:$0xff] }
  0xe0   : > { %v1077_v34 = vpop.eup %1076  ;;  %v503_v35 = vmul.f32 %v1436_v59, %v489_v33  ;;  %1102 = vpow2.f32 %v633_v23  ;;  %v515_v33 = vld [vmem:[%s1616_s1 + $0x30] sm:$0xff] }
  0xe1   : > { %v1079_v36 = vpop.eup %1078  ;;  %v685_v37 = vadd.f32 %v669_v31, %v509_v63  ;;  %1104 = vpow2.f32 %v456_v26 }
  0xe2   : > { %v1081_v38 = vpop.eup %1080  ;;  %v662_v39 = vsel %vm1432_vm5, %v1075_v30, %v1079_v36  ;;  %v519_v40 = vadd.f32 %v511_v32, %v503_v35  ;;  %1106 = vpow2.f32 %v635_v29 }
  0xe3   : > { %v1083_v41 = vpop.eup %1082  ;;  %935 = vst.msk [vmem:[%s1457_s6 + $0x40] sm:$0xff] %vm425_vm2, %v685_v37  ;;  %v670_v42 = vmul.f32 %v1436_v59, %v662_v39  ;;  %v490_v44 = vsel %vm1432_vm5, %v1077_v34, %v1081_v38 }
  0xe4   : > { %v1085_v45 = vpop.eup %1084  ;;  %527 = vst.msk [vmem:[%s1457_s6 + $0x10] sm:$0xff] %vm425_vm2, %v519_v40  ;;  %v504_v46 = vmul.f32 %v1436_v59, %v490_v44  ;;  %v641_v47 = vadd.f32 1.0, %v1083_v41  ;;  %1108 = vrcp.f32 %v1083_v41  ;;  %v516_v44 = vld [vmem:[%s1616_s1 + $0x38] sm:$0xff] }
  0xe5   : > { %v1087_v48 = vpop.eup %1086  ;;  %v686_v49 = vadd.f32 %v670_v42, %v510_v14 }
  0xe6   : > { %v1089_v50 = vpop.eup %1088  ;;  %v520_v51 = vadd.f32 %v512_v43, %v504_v46  ;;  %1110 = vrcp.f32 %v641_v47  ;;  %v463_v52 = vadd.f32 1.0, %v1087_v48 }
  0xe7   : > { %v1091_v53 = vpop.eup %1090  ;;  %936 = vst.msk [vmem:[%s1457_s6 + $0x48] sm:$0xff] %vm425_vm2, %v686_v49  ;;  %v663_v54 = vsel %vm1432_vm5, %v1085_v45, %v1089_v50  ;;  %1112 = vrcp.f32 %v1087_v48 }
  0xe8   : > { %v1093_v55 = vpop.eup %1092  ;;  %v671_v57 = vmul.f32 %v1436_v59, %v663_v54  ;;  %528 = vst.msk [vmem:[%s1457_s6 + $0x18] sm:$0xff] %vm425_vm2, %v520_v51  ;;  %1114 = vrcp.f32 %v463_v52 }
  0xe9   : > { %v1095_v58 = vpop.eup %1094 }
  0xea   : > { %v1097_v60 = vpop.eup %1096  ;;  %v687_v61 = vadd.f32 %v671_v57, %v511_v32  ;;  %v491_v63 = vsel %vm1432_vm5, %v1091_v53, %v1095_v58 }
  0xeb   : > { %v1099_v0 = vpop.eup %1098  ;;  %v664_v1 = vsel %vm1432_vm5, %v1093_v55, %v1097_v60  ;;  %v505_v2 = vmul.f32 %v1436_v59, %v491_v63 }
  0xec   : > { %v1101_v3 = vpop.eup %1100  ;;  %937 = vst.msk [vmem:[%s1457_s6 + $0x50] sm:$0xff] %vm425_vm2, %v687_v61  ;;  %v672_v4 = vmul.f32 %v1436_v59, %v664_v1  ;;  %v642_v5 = vadd.f32 1.0, %v1099_v0  ;;  %1116 = vrcp.f32 %v1099_v0 }
  0xed   : > { %v1103_v6 = vpop.eup %1102  ;;  %v521_v7 = vadd.f32 %v513_v62, %v505_v2  ;;  %v464_v8 = vadd.f32 1.0, %v1101_v3  ;;  %1118 = vrcp.f32 %v1101_v3 }
  0xee   : > { %v1105_v9 = vpop.eup %1104  ;;  %v688_v10 = vadd.f32 %v672_v4, %v512_v43  ;;  %1120 = vrcp.f32 %v642_v5  ;;  %v643_v11 = vadd.f32 1.0, %v1103_v6 }
  0xef   : > { %v1107_v12 = vpop.eup %1106  ;;  %529 = vst.msk [vmem:[%s1457_s6 + $0x20] sm:$0xff] %vm425_vm2, %v521_v7  ;;  %1122 = vrcp.f32 %v464_v8  ;;  %v465_v13 = vadd.f32 1.0, %v1105_v9 }
  0xf0   : > { %938 = vst.msk [vmem:[%s1457_s6 + $0x58] sm:$0xff] %vm425_vm2, %v688_v10  ;;  %1124 = vrcp.f32 %v643_v11  ;;  %v644_v14 = vadd.f32 1.0, %v1107_v12 }
  0xf1   : > { %1126 = vrcp.f32 %v1103_v6  ;;  %v1109_v15 = vpop.eup %1108 }
  0xf2   : > { %1128 = vrcp.f32 %v465_v13 }
  0xf3   : > { %v1111_v16 = vpop.eup %1110  ;;  %1130 = vrcp.f32 %v1105_v9 }
  0xf4   : > { %v1113_v17 = vpop.eup %1112  ;;  %v665_v18 = vsel %vm1432_vm5, %v1109_v15, %v1111_v16  ;;  %1132 = vrcp.f32 %v644_v14 }
  0xf5   : > { %v1115_v19 = vpop.eup %1114  ;;  %v673_v20 = vmul.f32 %v1436_v59, %v665_v18  ;;  %1134 = vrcp.f32 %v1107_v12 }
  0xf6   : > { %v492_v22 = vsel %vm1432_vm5, %v1113_v17, %v1115_v19 }
  0xf7   : > { %v689_v23 = vadd.f32 %v673_v20, %v513_v62  ;;  %v506_v24 = vmul.f32 %v1436_v59, %v492_v22 }
  0xf9   : > { %v1117_v25 = vpop.eup %1116  ;;  %939 = vst.msk [vmem:[%s1457_s6 + $0x60] sm:$0xff] %vm425_vm2, %v689_v23  ;;  %v522_v26 = vadd.f32 %v514_v21, %v506_v24 }
  0xfa   : > { %v1119_v27 = vpop.eup %1118 }
  0xfb   : > { %v1121_v28 = vpop.eup %1120  ;;  %530 = vst.msk [vmem:[%s1457_s6 + $0x28] sm:$0xff] %vm425_vm2, %v522_v26 }
  0xfc   : > { %v1123_v29 = vpop.eup %1122  ;;  %v666_v30 = vsel %vm1432_vm5, %v1117_v25, %v1121_v28 }
  0xfd   : > { %v1125_v31 = vpop.eup %1124  ;;  %v674_v32 = vmul.f32 %v1436_v59, %v666_v30  ;;  %v493_v34 = vsel %vm1432_vm5, %v1119_v27, %v1123_v29 }
  0xfe   : > { %v1127_v35 = vpop.eup %1126  ;;  %v507_v36 = vmul.f32 %v1436_v59, %v493_v34 }
  0xff   : > { %v1129_v37 = vpop.eup %1128  ;;  %v690_v38 = vadd.f32 %v674_v32, %v514_v21  ;;  %v667_v39 = vsel %vm1432_vm5, %v1127_v35, %v1125_v31 }
 0x100   : > { %v1131_v40 = vpop.eup %1130  ;;  %v523_v41 = vadd.f32 %v515_v33, %v507_v36  ;;  %v675_v42 = vmul.f32 %v1436_v59, %v667_v39 }
 0x101   : > { %v1133_v43 = vpop.eup %1132  ;;  %940 = vst.msk [vmem:[%s1457_s6 + $0x68] sm:$0xff] %vm425_vm2, %v690_v38  ;;  %v494_v45 = vsel %vm1432_vm5, %v1131_v40, %v1129_v37 }
 0x102   : > { %v1135_v46 = vpop.eup %1134  ;;  %531 = vst.msk [vmem:[%s1457_s6 + $0x30] sm:$0xff] %vm425_vm2, %v523_v41  ;;  %v691_v47 = vadd.f32 %v675_v42, %v515_v33  ;;  %v508_v48 = vmul.f32 %v1436_v59, %v494_v45 }
 0x103   : > { %v668_v49 = vsel %vm1432_vm5, %v1135_v46, %v1133_v43 }
 0x104   : > { %941 = vst.msk [vmem:[%s1457_s6 + $0x70] sm:$0xff] %vm425_vm2, %v691_v47  ;;  %v524_v50 = vadd.f32 %v516_v44, %v508_v48  ;;  %v676_v51 = vmul.f32 %v1436_v59, %v668_v49 }
 0x106   : > { %532 = vst.msk [vmem:[%s1457_s6 + $0x38] sm:$0xff] %vm425_vm2, %v524_v50  ;;  %v692_v52 = vadd.f32 %v676_v51, %v516_v44 }
 0x108   : > { %942 = vst.msk [vmem:[%s1457_s6 + $0x78] sm:$0xff] %vm425_vm2, %v692_v52 }
 0x109   : > { %s951_s8 = sshll.u32 %s1182_s18, 10  ;;  %s734_s9 = sshll.u32 %s1457_s6, 4  ;;  %s735_s9 = int_to_ptr.vmem [resolvable:$true] %s734_s9 }
 0x10a   : > { %s723_s13 = scalar_lea.hbm %s1618_s3, %s951_s8  ;;  %s1192_s21 = smov 1024  }
 0x10b   : > { %956 = sst [smem:[#allocation9]] (%p1268_p5), %s1192_s21  ;;  %s1193_s22 = smov 3072  }
 0x10c   : > { %957 = sst [smem:[#allocation9 + $0x1]] (%p1268_p5), %s1193_s22  ;;  %s1194_s24 = smov 8  }
 0x10d   : > { %958 = sst [smem:[#allocation9 + $0x2]] (%p1268_p5), %s1194_s24  ;;  %s1195_s26 = smov 128  }
 0x10e   : > { %959 = sst [smem:[#allocation9 + $0x3]] (%p1268_p5), %s1195_s26  ;;  %s1196_s18 = smov 131072  }
 0x10f   : > { %960 = sst [smem:[#allocation9 + $0x4]] (%p1268_p5), %s1195_s26  ;;  %s1197_s6 = smov 0  }
 0x110   : > { %961 = sst [smem:[#allocation9 + $0x5]] (%p1268_p5), %s1194_s24 }
 0x111   : > { %962 = dma.general (%p1268_p5), %s735_s9, 2048, %s723_s13, %s703_s5, %s1196_s18, [#allocation9], %s1197_s6, 0  }
 0x112   : > { %s765_s11 = scalar_lea.hbm %s1619_s4, %s951_s8  ;;  %s776_s12 = sshll.u32 %s1392_s14, 4  ;;  %s777_s12 = int_to_ptr.vmem [resolvable:$true] %s776_s12 }
 0x113   : > { %s1198_s21 = smov 1024   ;;  %s1199_s22 = smov 3072  }
 0x114   : > { %963 = sst [smem:[#allocation11]] (%p1268_p5), %s1198_s21  ;;  %s1200_s5 = smov 8  }
 0x115   : > { %964 = sst [smem:[#allocation11 + $0x1]] (%p1268_p5), %s1199_s22  ;;  %s1201_s9 = smov 128  }
 0x116   : > { %965 = sst [smem:[#allocation11 + $0x2]] (%p1268_p5), %s1200_s5  ;;  %s1202_s13 = smov 131072  }
 0x117   : > { %966 = sst [smem:[#allocation11 + $0x3]] (%p1268_p5), %s1201_s9  ;;  %s1203_s8 = smov 0  }
 0x118   : > { %967 = sst [smem:[#allocation11 + $0x4]] (%p1268_p5), %s1201_s9 }
 0x119   : > { %968 = sst [smem:[#allocation11 + $0x5]] (%p1268_p5), %s1200_s5 }
 0x11a   : > { %969 = dma.general (%p1268_p5), %s777_s12, 2048, %s765_s11, %s708_s7, %s1202_s13, [#allocation11], %s1203_s8, 0  }
 0x11b PF: > { %p979_p0 = scmp.ge.s32.totalorder %s1190_s20, 2  ;;  %s804_s14 = sand.u32 1, %s1170_s15  }
 0x11c   : > { %s805_s24 = scalar_lea.sflag [#allocation5], %s804_s14 }
 0x11d   : > { %p973_p1 = pnand %p979_p0, %p1279_p9 }
 0x11f   : > { %p974_p2 = pneg %p973_p1 }
 0x121   : > { %1161 = dma.done.wait (%p974_p2), %s805_s24, 2048  }
 0x122   : > { %1163 = vsyncadd (%p974_p2), %s805_s24, 4294965248  ;;  %s814_s26 = scalar_lea.sflag [#allocation7], %s804_s14 }
 0x123   : > { %1165 = dma.done.wait (%p974_p2), %s814_s26, 2048  }
 0x124   : > { %1167 = vsyncadd (%p974_p2), %s814_s26, 4294965248  ;;  %s21_s20 = sadd.s32 1, %s1190_s20   ;;  %s1624_s15 = smov %s1174_s16 }
 0x125   : > { %p18_p3 = scmp.ge.s32.totalorder %s21_s20, 5   ;;  %s1625_s16 = smov %s1178_s17 }
 0x126   : > { %s1626_s17 = smov %s1277_s27  ;;  %s1627_s18 = smov %s1186_s19 }
 0x127   : > { %s1628_s19 = smov %s1630_s23  ;;  %20 = sbr.rel (!%p18_p3) target bundleno = 6 (0x6), region = 141 }
 0x12c   :  { %819 = vsyncpa [#allocation5], 1 }
 0x12d   :  { %821 = vsyncpa [#allocation5 + $0x1], 1 }
 0x12e   :  { %822 = vsyncpa [#allocation7], 1 }
 0x12f   :  { %824 = vsyncpa [#allocation7 + $0x1], 1 }

// kernel: tpu_custom_call.1
= control target key start
LH: loop header
LB: loop body
LE: loop exit
PB: predicated region body
PF: predicated region fallthrough
CT: control target
= control target key end

     0   :  { %s1113_s0 = inlined_call_operand.hbm [shape: f32[2,3,64,85], index: 0, kind: input, shape index: {}]   ;;  %s1114_s1 = inlined_call_operand.hbm [shape: f32[64,85], index: 1, kind: input, shape index: {}]   ;;  %s1115_s2 = inlined_call_operand.vmem [shape: f32[3,1,85], index: 2, kind: input, shape index: {}]   ;;  %s1116_s3 = inlined_call_operand.hbm [shape: f32[2,3,64,85], index: 3, kind: output, shape index: {}]  }
   0x1   :  { %1124 = sst [smem:[#allocation15_spill]] %s1114_s1 }
   0x2   :  { %8 = vsyncpa [#allocation3], 0 }
   0x3   :  { %10 = vsyncpa [#allocation3 + $0x1], 0 }
   0x4   :  { %11 = vsyncpa [#allocation6], 0 }
   0x5   :  { %12 = vsyncpa [#allocation4], 0 }
   0x6   :  { %14 = vsyncpa [#allocation4 + $0x1], 0  ;;  %s846_s12 = smov 0   ;;  %s848_s13 = smov 0  }
   0x7   :  { %s850_s14 = smov 0   ;;  %s852_s15 = smov 0  }
   0x8   :  { %s854_s16 = smov 0   ;;  %s856_s17 = smov 0  }
   0x9   :  { %s858_s18 = smov 0   ;;  %s860_s19 = smov 0  }
   0xa LB: > { %1125 = sst [smem:[#allocation11_spill]] %s789_s12  ;;  %s494_s20 = sadd.s32 4294967295, %s817_s19   ;;  %s817_s19 = sphi %s860_s19, %s20_s19   ;;  %s813_s18 = sphi %s858_s18, %s1152_s18   ;;  %s809_s17 = sphi %s856_s17, %s1147_s17   ;;  %s805_s16 = sphi %s854_s16, %s1151_s16   ;;  %s801_s15 = sphi %s852_s15, %s1146_s15   ;;  %s797_s14 = sphi %s850_s14, %s1150_s14   ;;  %s793_s13 = sphi %s848_s13, %s1149_s13   ;;  %s789_s12 = sphi %s846_s12, %s1148_s12  }
   0xb   : > { %1126 = sst [smem:[#allocation12_spill]] %s809_s17  ;;  %s495_s21 = sadd.s32 4294967294, %s817_s19  }
   0xc   : > { %p54_p0 = scmp.ne.s32.totalorder %s793_s13, %s789_s12  ;;  %p890_p1 = scmp.eq.s32.totalorder %s494_s20, 0 }
   0xd   : > { %p894_p2 = scmp.eq.s32.totalorder %s494_s20, 5  ;;  %p133_p3 = scmp.eq.s32.totalorder %s495_s21, 5 }
   0xe   : > { %p900_p4 = por %p890_p1, %p54_p0  ;;  %p496_p5 = scmp.ge.s32.totalorder %s817_s19, 1 }
   0xf   : > { %p905_p6 = por %p133_p3, %p54_p0  ;;  %p140_p7 = scmp.lt.s32.totalorder %s817_s19, 7 }
  0x10   : > { %s1129_s24 = scalar_select %p900_p4, 1, 0 }
  0x11   : > { %s1130_s25 = scalar_select %p905_p6, 1, 0 }
  0x12   : > { %p910_p8 = pnand %p496_p5, %p140_p7  ;;  %s819_s27 = smov [#allocation5]  }
  0x13   : > { %1131 = sst [smem:[#allocation13_spill]] %s1130_s25  ;;  %s152_s28 = sshll.u32 %s819_s27, 4  ;;  %s153_s28 = int_to_ptr.vmem [resolvable:$true] %s152_s28 }
  0x14   : > { %p530_p9 = pneg %p910_p8  ;;  %s674_s29 = scalar_lea.vmem %s153_s28, 1024 }
  0x15   : > { %p675_p12 = scmp.ne.s32.totalorder %s153_s28, %s674_s29  ;;  %p682_p3 = scmp.lt.s32.totalorder %s153_s28, %s153_s28 }
  0x16   : > { %p531_p10 = pnand %p530_p9, %p890_p1  ;;  %p683_p6 = scmp.lt.s32.totalorder %s674_s29, %s674_s29 }
  0x18   : > { %p665_p11 = pneg %p531_p10  ;;  %p684_p4 = por %p683_p6, %p682_p3 }
  0x1a   : > { %p677_p13 = pnand %p675_p12, %p665_p11 }
  0x1c   : > { %p678_p0 = pneg %p677_p13 }
  0x1e   : > { %p685_p5 = pnand %p684_p4, %p678_p0 }
  0x20   : > { %688 = shalt.err (!%p685_p5)
}
  0x21   : > { %s1118_s30 = smov 128   ;;  %s1119_s4 = smov 8  }
  0x22   : > { %s1133_s1 = sld [smem:[#allocation15_spill]]  ;;  %s29_s7 = sadd.s32 1, %s809_s17 }
  0x23   : > { %p30_p4 = scmp.ge.s32.totalorder %s29_s7, 3  ;;  %s32_s8 = sadd.s32 1, %s813_s18 }
  0x24   : > { %s41_s9 = sadd.s32 1, %s797_s14  ;;  %p48_p6 = scmp.ne.s32.totalorder %s797_s14, %s793_s13 }
  0x25   : > { %s1154_s7 = smov (%p30_p4, %s29_s7), 0  ;;  %s1156_s8 = smov (!%p30_p4, %s32_s8), %s813_s18 }
  0x26   : > { %1134 = sst [smem:[#allocation14_spill]] %s1154_s7  ;;  %s37_s10 = ssub.s32 %s809_s17, %s1154_s7 }
  0x27   : > { %p49_p7 = scmp.eq.s32.totalorder %s817_s19, 0  ;;  %p34_p9 = scmp.ge.s32.totalorder %s1156_s8, 2 }
  0x28   : > { %533 = dma.hbm_to_vmem [thread:$0]  (!%p531_p10), %s1133_s1, 1024, %s153_s28, [#allocation6], %s1118_s30, %s1118_s30, %s1119_s4  }
  0x29   : > { %p937_p11 = por %p894_p2, %p48_p6  ;;  %p941_p10 = por %p49_p7, %p48_p6 }
  0x2a   : > { %p543_p12 = scmp.lt.s32.totalorder %s817_s19, 6  ;;  %s1158_s8 = smov (%p34_p9, %s1156_s8), 0 }
  0x2b   : > { %s166_s21 = sand.u32 1, %s797_s14   ;;  %s500_s27 = sshll.u32 %s809_s17, 3 }
  0x2c   : > { %s36_s28 = ssub.s32 %s813_s18, %s1158_s8  ;;  %s499_s5 = sshll.u32 %s166_s21, 6 }
  0x2d   : > { %s38_s29 = sor.u32 %s37_s10, %s36_s28  ;;  %s520_s23 = smul.u32 24, %s813_s18 }
  0x2e   : > { %p39_p13 = scmp.eq.s32.totalorder %s38_s29, 0  ;;  %s170_s6 = scalar_lea.vmem [#allocation2], %s499_s5 }
  0x2f   : > { %s179_s30 = sshll.u32 %s170_s6, 4  ;;  %s176_s1 = sadd.s32 %s520_s23, %s500_s27  ;;  %s180_s30 = int_to_ptr.vmem [resolvable:$true] %s179_s30 }
  0x30   : > { %s954_s4 = scalar_select %p39_p13, %s797_s14, %s41_s9  }
  0x31   : > { %s501_s7 = sshll.u32 %s176_s1, 7  ;;  %p960_p2 = pnand %p543_p12, %p941_p10 }
  0x32   : > { %s178_s10 = scalar_lea.hbm %s1113_s0, %s501_s7  ;;  %s167_s28 = scalar_lea.sflag [#allocation3], %s166_s21 }
  0x33   : > { %p691_p0 = pneg %p960_p2  ;;  %s702_s29 = scalar_lea.vmem %s180_s30, 1024 }
  0x34   : > { %p703_p3 = scmp.ne.s32.totalorder %s180_s30, %s702_s29  ;;  %s822_s9 = smov [#allocation2]  }
  0x35   : > { %s707_s1 = sshll.u32 %s822_s9, 4  ;;  %s708_s1 = int_to_ptr.vmem [resolvable:$false] %s707_s1 }
  0x36   : > { %p705_p5 = pnand %p703_p3, %p691_p0  ;;  %s709_s20 = scalar_lea.vmem %s708_s1, 2048 }
  0x37   : > { %p710_p6 = scmp.lt.s32.totalorder %s180_s30, %s708_s1  ;;  %p711_p7 = scmp.lt.s32.totalorder %s709_s20, %s702_s29 }
  0x38   : > { %p706_p4 = pneg %p705_p5 }
  0x39   : > { %p712_p9 = por %p711_p7, %p710_p6 }
  0x3b   : > { %p713_p10 = pnand %p712_p9, %p706_p4 }
  0x3d   : > { %716 = shalt.err (!%p713_p10)
}
  0x3e   : > { %s1138_s12 = smov 8   ;;  %s1139_s17 = smov 128  }
  0x3f   : > { %537 = dma.hbm_to_vmem [thread:$0]  (!%p960_p2), %s178_s10, 1024, %s180_s30, %s167_s28, %s1139_s17, %s1139_s17, %s1138_s12  }
  0x40   : > { %197 = sbr.rel (%p910_p8) target bundleno = 137 (0x89), region = 32  ;;  %s977_s7 = sand.u32 (!%p910_p8), 1, %s793_s13  }
  0x41   : > { %s503_s21 = sshll.u32 (!%p910_p8), %s977_s7, 6  ;;  %s200_s27 = scalar_lea.sflag (!%p910_p8), [#allocation3], %s977_s7 }
  0x42   : > { %s203_s5 = scalar_lea.vmem (!%p910_p8), [#allocation2], %s503_s21  ;;  %p1140_p12 = scmp.ne.s32.totalorder (!%p910_p8), %s1129_s24, 0 }
  0x45   : > { %776 = dma.done.wait (%p1140_p12), %s200_s27, 1024  }
  0x46   : > { %778 = vsyncadd (%p1140_p12), %s200_s27, 4294966272 }
  0x47   : > { %780 = dma.done.wait (%p890_p1), [#allocation6], 1024  }
  0x48   : > { %782 = vsyncadd (%p890_p1), [#allocation6], 4294966272  ;;  %v292_v0 = vlaneseq  ;;  %v236_v2 = vld [vmem:[%s203_s5] sm:$0xff]  ;;  %v237_v4 = vld [vmem:[%s203_s5 + $0x8] sm:$0xff]  ;;  %p233_p1 = scmp.lt.s32.totalorder %s801_s15, 2  ;;  %vm360_vm3 = vcmask 695296  }
  0x49   : > { %v506_v3 = vmul.f32 -1.442695, %v236_v2  ;;  %v238_v5 = vld [vmem:[%s203_s5 + $0x10] sm:$0xff]  ;;  %v507_v6 = vmul.f32 -1.442695, %v237_v4  ;;  %v239_v8 = vld [vmem:[%s203_s5 + $0x18] sm:$0xff] }
  0x4a   : > { %v293_v1 = vand.u32 127, %v292_v0  ;;  %v508_v7 = vmul.f32 -1.442695, %v238_v5  ;;  %v509_v9 = vmul.f32 -1.442695, %v239_v8  ;;  %v240_v10 = vld [vmem:[%s203_s5 + $0x20] sm:$0xff] }
  0x4b   : > { %615 = vpow2.f32 %v506_v3  ;;  %v241_v12 = vld [vmem:[%s203_s5 + $0x28] sm:$0xff]  ;;  %v510_v13 = vmul.f32 -1.442695, %v240_v10  ;;  %v242_v14 = vld [vmem:[%s203_s5 + $0x30] sm:$0xff]  ;;  %v243_v17 = vld [vmem:[%s203_s5 + $0x38] sm:$0xff]  ;;  %s234_s22 = scalar_select %p233_p1, %s801_s15, 2 }
  0x4c   : > { %vm294_vm0 = vcmp.ge.s32.totalorder %v293_v1, 2  ;;  %vm295_vm1 = vcmp.lt.s32.totalorder %v293_v1, 4  ;;  %617 = vpow2.f32 %v507_v6  ;;  %v511_v16 = vmul.f32 -1.442695, %v241_v12  ;;  %v344_v57 = vld [vmem:[#allocation5] sm:$0xff]  ;;  %v345_v62 = vld [vmem:[#allocation5 + $0x8] sm:$0xff] }
  0x4d   : > { %vm991_vm2 = vmand %vm294_vm0, %vm295_vm1  ;;  %619 = vpow2.f32 %v508_v7  ;;  %v512_v19 = vmul.f32 -1.442695, %v242_v14  ;;  %v513_v22 = vmul.f32 -1.442695, %v243_v17  ;;  %s235_s26 = scalar_lea.vmem %s1115_s2, %s234_s22  ;;  %s1024_s30 = scalar_lea.vmem [#allocation7], %s503_s21 }
  0x4e   : > { %v297_v15 = vsel %vm991_vm2, %v236_v2, 0.0  ;;  %621 = vpow2.f32 %v509_v9  ;;  %v298_v18 = vsel %vm991_vm2, %v237_v4, 0.0  ;;  %v299_v21 = vsel %vm991_vm2, %v238_v5, 0.0  ;;  %v514_v52 = vld [vmem:[%s235_s26] ss:$0 sm:$0xff]  ;;  %v346_v4 = vld [vmem:[#allocation5 + $0x10] sm:$0xff] }
  0x4f   : > { %623 = vpow2.f32 %v510_v13  ;;  %v305_v20 = vmul.f32 1.442695, %v297_v15  ;;  %v307_v23 = vmul.f32 1.442695, %v298_v18  ;;  %v300_v24 = vsel %vm991_vm2, %v239_v8, 0.0  ;;  %s521_s23 = smul.u32 24, %s805_s16 }
  0x50   : > { %625 = vpow2.f32 %v511_v16  ;;  %v309_v26 = vmul.f32 1.442695, %v299_v21  ;;  %v301_v28 = vsel %vm991_vm2, %v240_v10, 0.0  ;;  %v311_v30 = vmul.f32 1.442695, %v300_v24  ;;  %v347_v10 = vld [vmem:[#allocation5 + $0x18] sm:$0xff] }
  0x51   : > { %627 = vpow2.f32 %v512_v19  ;;  %v302_v32 = vsel %vm991_vm2, %v241_v12, 0.0  ;;  %v313_v34 = vmul.f32 1.442695, %v301_v28  ;;  %v303_v36 = vsel %vm991_vm2, %v242_v14, 0.0  ;;  %s516_s6 = sshll.u32 %s801_s15, 3  ;;  %v350_v28 = vld [vmem:[#allocation5 + $0x30] sm:$0xff] }
  0x52   : > { %629 = vpow2.f32 %v305_v20  ;;  %v315_v38 = vmul.f32 1.442695, %v302_v32  ;;  %v304_v40 = vsel %vm991_vm2, %v243_v17, 0.0  ;;  %v317_v42 = vmul.f32 1.442695, %v303_v36  ;;  %v348_v17 = vld [vmem:[#allocation5 + $0x20] sm:$0xff]  ;;  %s382_s15 = sadd.s32 %s521_s23, %s516_s6 }
  0x53   : > { %631 = vpow2.f32 %v513_v22  ;;  %v319_v45 = vmul.f32 1.442695, %v304_v40  ;;  %s385_s16 = sshll.u32 %s1024_s30, 4  ;;  %s517_s10 = sshll.u32 %s382_s15, 7  ;;  %s1051_s16 = int_to_ptr.vmem [resolvable:$true] %s385_s16 }
  0x54   : > { %633 = vpow2.f32 %v307_v23  ;;  %v349_v23 = vld [vmem:[#allocation5 + $0x28] sm:$0xff]  ;;  %s1058_s9 = scalar_lea.hbm %s1116_s3, %s517_s10  ;;  %s370_s1 = scalar_lea.sflag [#allocation4], %s977_s7 }
  0x55   : > { %s717_s20 = scalar_lea.vmem %s1051_s16, 1024  ;;  %s823_s12 = smov [#allocation7]  }
  0x56   : > { %p718_p8 = scmp.ne.s32.totalorder %s1051_s16, %s717_s20  ;;  %s721_s17 = sshll.u32 %s823_s12, 4  ;;  %s722_s17 = int_to_ptr.vmem [resolvable:$false] %s721_s17 }
  0x57   : > { %s723_s21 = scalar_lea.vmem %s722_s17, 2048  ;;  %p724_p0 = scmp.lt.s32.totalorder %s1051_s16, %s722_s17 }
  0x58   : > { %v616_v25 = vpop.eup %615  ;;  %p719_p13 = pnand %p718_p8, %p937_p11  ;;  %p725_p3 = scmp.lt.s32.totalorder %s723_s21, %s717_s20 }
  0x59   : > { %v268_v27 = vadd.f32 1.0, %v616_v25  ;;  %v618_v29 = vpop.eup %617 }
  0x5a   : > { %v269_v31 = vadd.f32 1.0, %v618_v29  ;;  %v620_v33 = vpop.eup %619  ;;  %p720_p2 = pneg %p719_p13  ;;  %p726_p5 = por %p725_p3, %p724_p0 }
  0x5b   : > { %635 = vrcp.f32 %v268_v27  ;;  %v270_v35 = vadd.f32 1.0, %v620_v33  ;;  %v622_v37 = vpop.eup %621  ;;  %v351_v33 = vld [vmem:[#allocation5 + $0x38] sm:$0xff] }
  0x5c   : > { %637 = vpow2.f32 %v309_v26  ;;  %v271_v39 = vadd.f32 1.0, %v622_v37  ;;  %v624_v41 = vpop.eup %623  ;;  %p727_p4 = pnand %p726_p5, %p720_p2 }
  0x5d   : > { %639 = vrcp.f32 %v269_v31  ;;  %v272_v43 = vadd.f32 1.0, %v624_v41  ;;  %v626_v44 = vpop.eup %625 }
  0x5e   : > { %641 = vpow2.f32 %v311_v30  ;;  %v273_v46 = vadd.f32 1.0, %v626_v44  ;;  %v628_v47 = vpop.eup %627 }
  0x5f   : > { %643 = vrcp.f32 %v270_v35  ;;  %v630_v48 = vpop.eup %629  ;;  %v274_v49 = vadd.f32 1.0, %v628_v47 }
  0x60   : > { %645 = vpow2.f32 %v313_v34  ;;  %v632_v50 = vpop.eup %631 }
  0x61   : > { %647 = vrcp.f32 %v271_v39  ;;  %v634_v51 = vpop.eup %633  ;;  %v275_v53 = vadd.f32 1.0, %v632_v50 }
  0x62   : > { %649 = vpow2.f32 %v315_v38 }
  0x63   : > { %651 = vrcp.f32 %v272_v43 }
  0x64   : > { %653 = vpow2.f32 %v317_v42 }
  0x65   : > { %655 = vrcp.f32 %v273_v46 }
  0x66   : > { %657 = vpow2.f32 %v319_v45 }
  0x67   : > { %659 = vrcp.f32 %v274_v49 }
  0x68   : > { %v636_v54 = vpop.eup %635  ;;  %661 = vrcp.f32 %v275_v53 }
  0x69   : > { %v638_v55 = vpop.eup %637  ;;  %v321_v56 = vsel %vm991_vm2, %v630_v48, %v636_v54 }
  0x6a   : > { %v640_v58 = vpop.eup %639  ;;  %v336_v59 = vmul.f32 %v514_v52, %v321_v56 }
  0x6b   : > { %v642_v60 = vpop.eup %641  ;;  %v322_v61 = vsel %vm991_vm2, %v634_v51, %v640_v58 }
  0x6c   : > { %v644_v63 = vpop.eup %643  ;;  %v352_v0 = vadd.f32 %v344_v57, %v336_v59  ;;  %v337_v1 = vmul.f32 %v514_v52, %v322_v61 }
  0x6d   : > { %v646_v2 = vpop.eup %645  ;;  %v323_v3 = vsel %vm991_vm2, %v638_v55, %v644_v63 }
  0x6e   : > { %v648_v5 = vpop.eup %647  ;;  %361 = vst.msk [vmem:[%s1024_s30] sm:$0xff] %vm360_vm3, %v352_v0  ;;  %v353_v6 = vadd.f32 %v345_v62, %v337_v1  ;;  %v338_v7 = vmul.f32 %v514_v52, %v323_v3 }
  0x6f   : > { %v650_v8 = vpop.eup %649  ;;  %v324_v9 = vsel %vm991_vm2, %v642_v60, %v648_v5 }
  0x70   : > { %v652_v12 = vpop.eup %651  ;;  %362 = vst.msk [vmem:[%s1024_s30 + $0x8] sm:$0xff] %vm360_vm3, %v353_v6  ;;  %v354_v13 = vadd.f32 %v346_v4, %v338_v7  ;;  %v339_v14 = vmul.f32 %v514_v52, %v324_v9 }
  0x71   : > { %v654_v15 = vpop.eup %653  ;;  %v325_v16 = vsel %vm991_vm2, %v646_v2, %v652_v12 }
  0x72   : > { %v656_v18 = vpop.eup %655  ;;  %363 = vst.msk [vmem:[%s1024_s30 + $0x10] sm:$0xff] %vm360_vm3, %v354_v13  ;;  %v355_v19 = vadd.f32 %v347_v10, %v339_v14  ;;  %v340_v20 = vmul.f32 %v514_v52, %v325_v16 }
  0x73   : > { %v658_v21 = vpop.eup %657  ;;  %v326_v22 = vsel %vm991_vm2, %v650_v8, %v656_v18 }
  0x74   : > { %v660_v24 = vpop.eup %659  ;;  %364 = vst.msk [vmem:[%s1024_s30 + $0x18] sm:$0xff] %vm360_vm3, %v355_v19  ;;  %v356_v25 = vadd.f32 %v348_v17, %v340_v20  ;;  %v341_v26 = vmul.f32 %v514_v52, %v326_v22 }
  0x75   : > { %v327_v27 = vsel %vm991_vm2, %v654_v15, %v660_v24  ;;  %v662_v29 = vpop.eup %661 }
  0x76   : > { %365 = vst.msk [vmem:[%s1024_s30 + $0x20] sm:$0xff] %vm360_vm3, %v356_v25  ;;  %v357_v30 = vadd.f32 %v349_v23, %v341_v26  ;;  %v342_v31 = vmul.f32 %v514_v52, %v327_v27  ;;  %v328_v32 = vsel %vm991_vm2, %v658_v21, %v662_v29 }
  0x77   : > { %v343_v35 = vmul.f32 %v514_v52, %v328_v32 }
  0x78   : > { %366 = vst.msk [vmem:[%s1024_s30 + $0x28] sm:$0xff] %vm360_vm3, %v357_v30  ;;  %v358_v34 = vadd.f32 %v350_v28, %v342_v31 }
  0x79   : > { %v359_v36 = vadd.f32 %v351_v33, %v343_v35 }
  0x7a   : > { %367 = vst.msk [vmem:[%s1024_s30 + $0x30] sm:$0xff] %vm360_vm3, %v358_v34 }
  0x7b   : > { %368 = vst.msk [vmem:[%s1024_s30 + $0x38] sm:$0xff] %vm360_vm3, %v359_v36 }
  0x7c   : > { %730 = shalt.err (!%p727_p4)
}
  0x7d   : > { %s731_s27 = scalar_lea.hbm %s1058_s9, 1024  ;;  %s735_s24 = scalar_lea.hbm %s1116_s3, 6144 }
  0x7e   : > { %p732_p6 = scmp.ne.s32.totalorder %s1058_s9, %s731_s27  ;;  %p736_p10 = scmp.lt.s32.totalorder %s1058_s9, %s1116_s3 }
  0x7f   : > { %p737_p12 = scmp.lt.s32.totalorder %s735_s24, %s731_s27 }
  0x80   : > { %p733_p7 = pnand %p732_p6, %p937_p11 }
  0x81   : > { %p738_p1 = por %p737_p12, %p736_p10 }
  0x82   : > { %p734_p9 = pneg %p733_p7 }
  0x84   : > { %p739_p8 = pnand %p738_p1, %p734_p9 }
  0x86   : > { %742 = shalt.err (!%p739_p8)
}
  0x87   : > { %s824_s30 = smov 128   ;;  %s825_s23 = smov 8  }
  0x88   : > { %528 = dma.vmem_to_hbm [thread:$0]  (%p937_p11), %s1051_s16, 1024, %s1058_s9, %s370_s1, %s824_s30, %s824_s30, %s825_s23  }
  0x89 PF: > { %s1143_s6 = sld [smem:[#allocation11_spill]]  ;;  %p545_p13 = scmp.ge.s32.totalorder %s817_s19, 2 }
  0x8a   : > { %s1144_s15 = sld [smem:[#allocation13_spill]] }
  0x8f   : > { %s400_s10 = sand.u32 1, %s1143_s6  }
  0x90   : > { %p1145_p2 = scmp.ne.s32.totalorder %s1144_s15, 0  ;;  %s401_s28 = scalar_lea.sflag [#allocation4], %s400_s10 }
  0x92   : > { %p539_p0 = pnand %p545_p13, %p1145_p2 }
  0x94   : > { %p540_p3 = pneg %p539_p0 }
  0x96   : > { %784 = dma.done.wait (%p540_p3), %s401_s28, 1024  }
  0x97   : > { %786 = vsyncadd (%p540_p3), %s401_s28, 4294966272  ;;  %s20_s19 = sadd.s32 1, %s817_s19   ;;  %s1146_s15 = sld [smem:[#allocation12_spill]] }
  0x98   : > { %p17_p5 = scmp.ge.s32.totalorder %s20_s19, 8   ;;  %s1147_s17 = sld [smem:[#allocation14_spill]] }
  0x99   : > { %s1148_s12 = smov %s793_s13  ;;  %s1149_s13 = smov %s797_s14 }
  0x9a   : > { %s1150_s14 = smov %s954_s4  ;;  %s1151_s16 = smov %s813_s18 }
  0x9b   : > { %s1152_s18 = smov %s1158_s8  ;;  %19 = sbr.rel (!%p17_p5) target bundleno = 10 (0xa), region = 84 }
  0xa0   :  { %406 = vsyncpa [#allocation3], 1 }
  0xa1   :  { %408 = vsyncpa [#allocation3 + $0x1], 1 }
  0xa2   :  { %409 = vsyncpa [#allocation6], 1 }
  0xa3   :  { %410 = vsyncpa [#allocation4], 1 }
  0xa4   :  { %412 = vsyncpa [#allocation4 + $0x1], 1 }

</bundles_post_ra>
